<compile_context>
chip_gen: v6e
topology: v6e:2x2x1
jax: 0.10.0
libtpu: 0.0.40
codegen_flags: <defaults>
</compile_context>

<pallas_src>
import jax
import jax.numpy as jnp
from jax.experimental import pallas as pl
from jax.experimental.pallas import tpu as pltpu

# ---- module hyper-parameters (consistent with the module) ----
BATCH = 16            # demo batch; real usage typically >= 128
AE_SIZE = 256         # autoregressive_embedding_size
HIDDEN = 256          # original_256
MAX_DELAY = 128       # SFS.last_delay
DELAY_LANES = 128     # lane-dense width for the sampled-index output
MAX_BATCH_TILE = 1024 # cap per-step tile so huge batches still fit in VMEM


def _device_kind():
    try:
        return jax.devices()[0].device_kind.lower()
    except Exception:
        return ""


def _num_tensorcores(kind):
    # v7x has 2 TensorCores per chip; v5e/v6e have 1.
    return 2 if "v7" in kind else 1


def _elementwise_dtype(kind):
    # v6e/v7x VALUs have native bf16; v5e (and older) do not -> keep f32 there.
    return jnp.bfloat16 if ("v6" in kind or "v7" in kind) else jnp.float32


def _pick_batch_tile(batch, num_tc):
    # One full-size step per TensorCore; only tile further for huge batches.
    if num_tc > 1 and batch % (8 * num_tc) == 0:
        tile = batch // num_tc
    else:
        tile = batch
    while tile > MAX_BATCH_TILE and tile % 2 == 0 and (tile // 2) % 8 == 0:
        tile //= 2
    return tile


def _make_kernel(act_dtype):
    def kernel(ae_ref, gumbel_ref,
               w1_ref, b1_ref, w2_ref, b2_ref, we_ref, be_ref,
               w3_ref, b3_ref, w4_ref, b4_ref, wp_ref, bp_ref,
               logits_ref, delay_ref, y_ref):
        def dense_relu(x_bf16, w_ref, b_ref):
            # bf16 MXU operands, f32 accumulation; bias-add/ReLU in act_dtype.
            acc = jnp.dot(x_bf16, w_ref[...], preferred_element_type=jnp.float32)
            h = acc.astype(act_dtype) + b_ref[...].astype(act_dtype)
            return jnp.maximum(h, 0.0).astype(jnp.bfloat16)

        # x = relu(fc_2(relu(fc_1(ae))))
        x = dense_relu(ae_ref[...].astype(jnp.bfloat16), w1_ref, b1_ref)
        x = dense_relu(x, w2_ref, b2_ref)

        # delay_logits = embed_fc(x)   (kept in f32)
        logits = jnp.dot(x, we_ref[...],
                         preferred_element_type=jnp.float32) + be_ref[...]
        logits_ref[...] = logits

        # delay = multinomial(softmax(logits), 1)  ==  argmax(logits + Gumbel)
        scores = logits + gumbel_ref[...]
        d = scores.shape[-1]
        lane = jax.lax.broadcasted_iota(jnp.int32, scores.shape, 1)
        max_s = jnp.max(scores, axis=-1, keepdims=True)
        idx = jnp.min(jnp.where(scores >= max_s, lane, d),
                      axis=-1, keepdims=True)                      # first argmax
        # Lane-dense int32 store (unmasked vst); the wrapper slices [:, :1].
        delay_ref[...] = jnp.broadcast_to(idx, delay_ref.shape)

        # one_hot(delay, max_delay).squeeze(-2); exact 0/1 so bf16 is lossless
        one_hot = (lane == idx).astype(jnp.bfloat16)

        # t = project(relu(fc_4(relu(fc_3(one_hot)))))
        z = dense_relu(one_hot, w3_ref, b3_ref)
        z = dense_relu(z, w4_ref, b4_ref)
        t = jnp.dot(z, wp_ref[...],
                    preferred_element_type=jnp.float32) + bp_ref[...]

        # autoregressive_embedding = autoregressive_embedding + t
        # (re-read the resident VMEM block -> no live range across the matmuls)
        y_ref[...] = ae_ref[...] + t

    return kernel


def delay_head_forward(ae, gumbel, params, *, batch_tile=None):
    """Fused DelayHead forward. Returns (delay_logits, delay, new_ae)."""
    B, A = ae.shape
    D = gumbel.shape[-1]

    kind = _device_kind()
    num_tc = _num_tensorcores(kind)
    act_dtype = _elementwise_dtype(kind)

    TB = batch_tile if batch_tile is not None else _pick_batch_tile(B, num_tc)
    TB = min(TB, B)
    assert B % TB == 0, "batch must be a multiple of the batch tile"
    grid = (B // TB,)

    weight_bytes = sum(int(p.size) * p.dtype.itemsize for p in params)
    io_tile_bytes = TB * 4 * (A + D + D + DELAY_LANES + A)
    # worst case: double-buffered activation tiles + double-buffered weights + slack
    vmem_need = 2 * io_tile_bytes + 2 * weight_bytes + (4 << 20)
    vmem_limit = int(min(vmem_need, 64 << 20)) if vmem_need > (12 << 20) else None

    cost = pl.CostEstimate(
        flops=2 * B * (A * HIDDEN + HIDDEN * HIDDEN + HIDDEN * D
                       + D * HIDDEN + HIDDEN * HIDDEN + HIDDEN * A),
        transcendentals=0,
        bytes_accessed=weight_bytes + io_tile_bytes * grid[0],
    )

    def build(single_buffer_weights):
        def batched(shape):
            return pl.BlockSpec(shape, lambda i: (i, 0))

        def resident(shape):
            # constant block index -> weights stay resident in VMEM across steps
            if single_buffer_weights:
                return pl.BlockSpec(shape, lambda i: (0, 0),
                                    pipeline_mode=pl.Buffered(1))
            return pl.BlockSpec(shape, lambda i: (0, 0))

        in_specs = [batched((TB, A)),            # autoregressive_embedding
                    batched((TB, D))]            # gumbel noise
        in_specs += [resident(p.shape) for p in params]

        out_specs = (
            batched((TB, D)),                    # delay_logits
            batched((TB, DELAY_LANES)),          # delay index, lane-dense
            batched((TB, A)),                    # new autoregressive_embedding
        )

        return pl.pallas_call(
            _make_kernel(act_dtype),
            out_shape=(
                jax.ShapeDtypeStruct((B, D), jnp.float32),
                jax.ShapeDtypeStruct((B, DELAY_LANES), jnp.int32),
                jax.ShapeDtypeStruct((B, A), jnp.float32),
            ),
            grid=grid,
            in_specs=in_specs,
            out_specs=out_specs,
            compiler_params=pltpu.CompilerParams(
                dimension_semantics=("parallel",),   # v7x: one half-batch per TC
                vmem_limit_bytes=vmem_limit),
            cost_estimate=cost,
        )

    # Prefer single-buffered resident weights; fall back to default specs if the
    # installed JAX/Mosaic build does not accept pipeline_mode=pl.Buffered(1).
    try:
        logits, delay_full, new_ae = build(True)(ae, gumbel, *params)
    except Exception:
        logits, delay_full, new_ae = build(False)(ae, gumbel, *params)

    return logits, delay_full[:, :1], new_ae


def init_params(key):
    """Deterministic init. Weights stored [in, out] (transposed vs PyTorch), bf16.
    Biases stay f32 (cast inside the kernel to the elementwise dtype)."""
    def linear(key, n_in, n_out):
        kw, kb = jax.random.split(key)
        bound = 1.0 / jnp.sqrt(n_in)
        w = jax.random.uniform(kw, (n_in, n_out), jnp.float32, -bound, bound)
        b = jax.random.uniform(kb, (1, n_out), jnp.float32, -bound, bound)
        return w.astype(jnp.bfloat16), b

    keys = jax.random.split(key, 6)
    w1, b1 = linear(keys[0], AE_SIZE, HIDDEN)     # fc_1
    w2, b2 = linear(keys[1], HIDDEN, HIDDEN)      # fc_2
    we, be = linear(keys[2], HIDDEN, MAX_DELAY)   # embed_fc
    w3, b3 = linear(keys[3], MAX_DELAY, HIDDEN)   # fc_3
    w4, b4 = linear(keys[4], HIDDEN, HIDDEN)      # fc_4
    wp, bp = linear(keys[5], HIDDEN, AE_SIZE)     # project
    return (w1, b1, w2, b2, we, be, w3, b3, w4, b4, wp, bp)


def delay_head_reference(ae, gumbel, params, delay_from_kernel=None):
    """Pure-JAX reference with the same bf16-operand / f32-accumulate math."""
    (w1, b1, w2, b2, we, be, w3, b3, w4, b4, wp, bp) = params

    def dense_relu(x, w, b):
        acc = jnp.dot(x.astype(jnp.bfloat16), w,
                      preferred_element_type=jnp.float32)
        return jnp.maximum(acc + b, 0.0)

    x = dense_relu(ae, w1, b1)
    x = dense_relu(x, w2, b2)
    logits = jnp.dot(x.astype(jnp.bfloat16), we,
                     preferred_element_type=jnp.float32) + be
    delay = jnp.argmax(logits + gumbel, axis=-1).astype(jnp.int32)[:, None]
    use_delay = delay if delay_from_kernel is None else delay_from_kernel
    one_hot = jax.nn.one_hot(use_delay[:, 0], MAX_DELAY, dtype=jnp.float32)
    z = dense_relu(one_hot, w3, b3)
    z = dense_relu(z, w4, b4)
    t = jnp.dot(z.astype(jnp.bfloat16), wp,
                preferred_element_type=jnp.float32) + bp
    return logits, delay, ae + t


if __name__ == "__main__":
    key = jax.random.PRNGKey(0)
    k_in, k_params, k_sample = jax.random.split(key, 3)

    ae = jax.random.normal(k_in, (BATCH, AE_SIZE), dtype=jnp.float32)
    params = init_params(k_params)
    # Fresh Gumbel noise per call/step (caller folds in the step index).
    gumbel = jax.random.gumbel(k_sample, (BATCH, MAX_DELAY), dtype=jnp.float32)

    # TODO(synk): when DelayHead runs once per autoregressive step, fuse it with
    # the adjacent head(s) into one pallas_call (or cross-call-prefetch the
    # ~0.5 MB of weights) so the recurring weight HBM->VMEM DMA is hidden.
    delay_logits, delay, new_ae = delay_head_forward(ae, gumbel, params)
    jax.block_until_ready((delay_logits, delay, new_ae))

    # shape / dtype / range checks
    assert delay_logits.shape == (BATCH, MAX_DELAY) and delay_logits.dtype == jnp.float32
    assert delay.shape == (BATCH, 1) and delay.dtype == jnp.int32
    assert new_ae.shape == ae.shape and new_ae.dtype == jnp.float32
    assert bool(jnp.all((delay >= 0) & (delay < MAX_DELAY)))
    assert bool(jnp.all(jnp.isfinite(delay_logits)))
    assert bool(jnp.all(jnp.isfinite(new_ae)))

    # sampling invariant: returned index is the Gumbel-max of the returned logits
    ref_idx = jnp.argmax(delay_logits + gumbel, axis=-1).astype(jnp.int32)[:, None]
    assert bool(jnp.all(delay == ref_idx))

    # pure-JAX reference (one-hot taken from the kernel's sample to decouple RNG)
    ref_logits, _, ref_new_ae = delay_head_reference(ae, gumbel, params, delay)
    assert bool(jnp.allclose(delay_logits, ref_logits, atol=0.1, rtol=0.1))
    assert bool(jnp.allclose(new_ae, ref_new_ae, atol=0.1, rtol=0.1))

    print("KERNEL_OK")
</pallas_src>

<mosaic_0001>
module attributes {stable_mosaic.version = 11 : i64} {
  func.func @kernel(%arg0: i32, %arg1: memref<16x256xf32, #tpu.memory_space<vmem>>, %arg2: memref<16x128xf32, #tpu.memory_space<vmem>>, %arg3: memref<256x256xbf16, #tpu.memory_space<vmem>>, %arg4: memref<1x256xf32, #tpu.memory_space<vmem>>, %arg5: memref<256x256xbf16, #tpu.memory_space<vmem>>, %arg6: memref<1x256xf32, #tpu.memory_space<vmem>>, %arg7: memref<256x128xbf16, #tpu.memory_space<vmem>>, %arg8: memref<1x128xf32, #tpu.memory_space<vmem>>, %arg9: memref<128x256xbf16, #tpu.memory_space<vmem>>, %arg10: memref<1x256xf32, #tpu.memory_space<vmem>>, %arg11: memref<256x256xbf16, #tpu.memory_space<vmem>>, %arg12: memref<1x256xf32, #tpu.memory_space<vmem>>, %arg13: memref<256x256xbf16, #tpu.memory_space<vmem>>, %arg14: memref<1x256xf32, #tpu.memory_space<vmem>>, %arg15: memref<16x128xf32, #tpu.memory_space<vmem>>, %arg16: memref<16x128xi32, #tpu.memory_space<vmem>>, %arg17: memref<16x256xf32, #tpu.memory_space<vmem>>) attributes {dimension_semantics = [#tpu.dimension_semantics<parallel>], iteration_bounds = array<i64: 1>, scalar_prefetch = 0 : i64, scratch_operands = 0 : i64, tpu.core_type = #tpu.core_type<tc>, window_params = [{transform_indices = @transform_0, window_bounds = array<i64: 16, 256>}, {transform_indices = @transform_1, window_bounds = array<i64: 16, 128>}, {pipeline_mode = #tpu.pipeline_mode<synchronous>, transform_indices = @transform_2, window_bounds = array<i64: 256, 256>}, {pipeline_mode = #tpu.pipeline_mode<synchronous>, transform_indices = @transform_3, window_bounds = array<i64: 1, 256>}, {pipeline_mode = #tpu.pipeline_mode<synchronous>, transform_indices = @transform_4, window_bounds = array<i64: 256, 256>}, {pipeline_mode = #tpu.pipeline_mode<synchronous>, transform_indices = @transform_5, window_bounds = array<i64: 1, 256>}, {pipeline_mode = #tpu.pipeline_mode<synchronous>, transform_indices = @transform_6, window_bounds = array<i64: 256, 128>}, {pipeline_mode = #tpu.pipeline_mode<synchronous>, transform_indices = @transform_7, window_bounds = array<i64: 1, 128>}, {pipeline_mode = #tpu.pipeline_mode<synchronous>, transform_indices = @transform_8, window_bounds = array<i64: 128, 256>}, {pipeline_mode = #tpu.pipeline_mode<synchronous>, transform_indices = @transform_9, window_bounds = array<i64: 1, 256>}, {pipeline_mode = #tpu.pipeline_mode<synchronous>, transform_indices = @transform_10, window_bounds = array<i64: 256, 256>}, {pipeline_mode = #tpu.pipeline_mode<synchronous>, transform_indices = @transform_11, window_bounds = array<i64: 1, 256>}, {pipeline_mode = #tpu.pipeline_mode<synchronous>, transform_indices = @transform_12, window_bounds = array<i64: 256, 256>}, {pipeline_mode = #tpu.pipeline_mode<synchronous>, transform_indices = @transform_13, window_bounds = array<i64: 1, 256>}, {transform_indices = @transform_14, window_bounds = array<i64: 16, 128>}, {transform_indices = @transform_15, window_bounds = array<i64: 16, 128>}, {transform_indices = @transform_16, window_bounds = array<i64: 16, 256>}]} {
    %c0 = arith.constant 0 : index
    %c0_0 = arith.constant 0 : index
    %0 = vector.load %arg1[%c0, %c0_0] : memref<16x256xf32, #tpu.memory_space<vmem>>, vector<16x256xf32>
    %1 = arith.truncf %0 : vector<16x256xf32> to vector<16x256xbf16>
    %c0_1 = arith.constant 0 : index
    %c0_2 = arith.constant 0 : index
    %2 = vector.load %arg3[%c0_1, %c0_2] : memref<256x256xbf16, #tpu.memory_space<vmem>>, vector<256x256xbf16>
    %cst = arith.constant dense<0.000000e+00> : vector<16x256xf32>
    %3 = tpu.matmul %1, %2, %cst {dimension_numbers = #tpu.dot_dimension_numbers<[1], [0], [0], [1], [0, 0, 1, 1], [], []>} : vector<16x256xbf16>, vector<256x256xbf16>, vector<16x256xf32> -> vector<16x256xf32>
    %c0_3 = arith.constant 0 : index
    %c0_4 = arith.constant 0 : index
    %4 = vector.load %arg4[%c0_3, %c0_4] : memref<1x256xf32, #tpu.memory_space<vmem>>, vector<1x256xf32>
    %5 = vector.broadcast %4 : vector<1x256xf32> to vector<16x256xf32>
    %6 = arith.addf %3, %5 : vector<16x256xf32>
    %cst_5 = arith.constant 0.000000e+00 : f32
    %7 = vector.broadcast %cst_5 : f32 to vector<16x256xf32>
    %8 = arith.maximumf %6, %7 : vector<16x256xf32>
    %9 = arith.truncf %8 : vector<16x256xf32> to vector<16x256xbf16>
    %c0_6 = arith.constant 0 : index
    %c0_7 = arith.constant 0 : index
    %10 = vector.load %arg5[%c0_6, %c0_7] : memref<256x256xbf16, #tpu.memory_space<vmem>>, vector<256x256xbf16>
    %cst_8 = arith.constant dense<0.000000e+00> : vector<16x256xf32>
    %11 = tpu.matmul %9, %10, %cst_8 {dimension_numbers = #tpu.dot_dimension_numbers<[1], [0], [0], [1], [0, 0, 1, 1], [], []>} : vector<16x256xbf16>, vector<256x256xbf16>, vector<16x256xf32> -> vector<16x256xf32>
    %c0_9 = arith.constant 0 : index
    %c0_10 = arith.constant 0 : index
    %12 = vector.load %arg6[%c0_9, %c0_10] : memref<1x256xf32, #tpu.memory_space<vmem>>, vector<1x256xf32>
    %13 = vector.broadcast %12 : vector<1x256xf32> to vector<16x256xf32>
    %14 = arith.addf %11, %13 : vector<16x256xf32>
    %cst_11 = arith.constant 0.000000e+00 : f32
    %15 = vector.broadcast %cst_11 : f32 to vector<16x256xf32>
    %16 = arith.maximumf %14, %15 : vector<16x256xf32>
    %17 = arith.truncf %16 : vector<16x256xf32> to vector<16x256xbf16>
    %c0_12 = arith.constant 0 : index
    %c0_13 = arith.constant 0 : index
    %18 = vector.load %arg7[%c0_12, %c0_13] : memref<256x128xbf16, #tpu.memory_space<vmem>>, vector<256x128xbf16>
    %cst_14 = arith.constant dense<0.000000e+00> : vector<16x128xf32>
    %19 = tpu.matmul %17, %18, %cst_14 {dimension_numbers = #tpu.dot_dimension_numbers<[1], [0], [0], [1], [0, 0, 1, 1], [], []>} : vector<16x256xbf16>, vector<256x128xbf16>, vector<16x128xf32> -> vector<16x128xf32>
    %c0_15 = arith.constant 0 : index
    %c0_16 = arith.constant 0 : index
    %20 = vector.load %arg8[%c0_15, %c0_16] : memref<1x128xf32, #tpu.memory_space<vmem>>, vector<1x128xf32>
    %21 = vector.broadcast %20 : vector<1x128xf32> to vector<16x128xf32>
    %22 = arith.addf %19, %21 : vector<16x128xf32>
    %c0_17 = arith.constant 0 : index
    %c0_18 = arith.constant 0 : index
    %23 = vector.load %arg15[%c0_17, %c0_18] : memref<16x128xf32, #tpu.memory_space<vmem>>, vector<16x128xf32>
    tpu.vector_store %arg15[%c0_17, %c0_18], %22 {strides = array<i32>} : memref<16x128xf32, #tpu.memory_space<vmem>>, vector<16x128xf32>,
    %c0_19 = arith.constant 0 : index
    %c0_20 = arith.constant 0 : index
    %24 = vector.load %arg2[%c0_19, %c0_20] : memref<16x128xf32, #tpu.memory_space<vmem>>, vector<16x128xf32>
    %25 = arith.addf %22, %24 : vector<16x128xf32>
    %26 = tpu.iota {dimensions = array<i32: 1>} : vector<16x128xi32>
    %cst_21 = arith.constant dense<0xFF800000> : vector<16xf32>
    %27 = vector.multi_reduction <maximumf>, %25, %cst_21 [1] : vector<16x128xf32> to vector<16xf32>
    %28 = vector.shape_cast %27 : vector<16xf32> to vector<16x1xf32>
    %29 = vector.broadcast %28 : vector<16x1xf32> to vector<16x128xf32>
    %30 = arith.cmpf oge, %25, %29 : vector<16x128xf32>
    %c128_i32 = arith.constant 128 : i32
    %31 = vector.broadcast %c128_i32 : i32 to vector<16x128xi32>
    %32 = arith.select %30, %26, %31 : vector<16x128xi1>, vector<16x128xi32>
    %cst_22 = arith.constant dense<2147483647> : vector<16xi32>
    %33 = vector.multi_reduction <minsi>, %32, %cst_22 [1] : vector<16x128xi32> to vector<16xi32>
    %34 = vector.shape_cast %33 : vector<16xi32> to vector<16x1xi32>
    %35 = vector.shape_cast %34 : vector<16x1xi32> to vector<16x1xi32>
    %36 = vector.broadcast %35 : vector<16x1xi32> to vector<16x128xi32>
    %c0_23 = arith.constant 0 : index
    %c0_24 = arith.constant 0 : index
    %37 = vector.load %arg16[%c0_23, %c0_24] : memref<16x128xi32, #tpu.memory_space<vmem>>, vector<16x128xi32>
    tpu.vector_store %arg16[%c0_23, %c0_24], %36 {strides = array<i32>} : memref<16x128xi32, #tpu.memory_space<vmem>>, vector<16x128xi32>,
    %38 = vector.broadcast %34 : vector<16x1xi32> to vector<16x128xi32>
    %39 = arith.cmpi eq, %26, %38 : vector<16x128xi32>
    %40 = arith.extui %39 : vector<16x128xi1> to vector<16x128xi32>
    %41 = arith.sitofp %40 : vector<16x128xi32> to vector<16x128xf32>
    %42 = arith.truncf %41 : vector<16x128xf32> to vector<16x128xbf16>
    %c0_25 = arith.constant 0 : index
    %c0_26 = arith.constant 0 : index
    %43 = vector.load %arg9[%c0_25, %c0_26] : memref<128x256xbf16, #tpu.memory_space<vmem>>, vector<128x256xbf16>
    %cst_27 = arith.constant dense<0.000000e+00> : vector<16x256xf32>
    %44 = tpu.matmul %42, %43, %cst_27 {dimension_numbers = #tpu.dot_dimension_numbers<[1], [0], [0], [1], [0, 0, 1, 1], [], []>} : vector<16x128xbf16>, vector<128x256xbf16>, vector<16x256xf32> -> vector<16x256xf32>
    %c0_28 = arith.constant 0 : index
    %c0_29 = arith.constant 0 : index
    %45 = vector.load %arg10[%c0_28, %c0_29] : memref<1x256xf32, #tpu.memory_space<vmem>>, vector<1x256xf32>
    %46 = vector.broadcast %45 : vector<1x256xf32> to vector<16x256xf32>
    %47 = arith.addf %44, %46 : vector<16x256xf32>
    %cst_30 = arith.constant 0.000000e+00 : f32
    %48 = vector.broadcast %cst_30 : f32 to vector<16x256xf32>
    %49 = arith.maximumf %47, %48 : vector<16x256xf32>
    %50 = arith.truncf %49 : vector<16x256xf32> to vector<16x256xbf16>
    %c0_31 = arith.constant 0 : index
    %c0_32 = arith.constant 0 : index
    %51 = vector.load %arg11[%c0_31, %c0_32] : memref<256x256xbf16, #tpu.memory_space<vmem>>, vector<256x256xbf16>
    %cst_33 = arith.constant dense<0.000000e+00> : vector<16x256xf32>
    %52 = tpu.matmul %50, %51, %cst_33 {dimension_numbers = #tpu.dot_dimension_numbers<[1], [0], [0], [1], [0, 0, 1, 1], [], []>} : vector<16x256xbf16>, vector<256x256xbf16>, vector<16x256xf32> -> vector<16x256xf32>
    %c0_34 = arith.constant 0 : index
    %c0_35 = arith.constant 0 : index
    %53 = vector.load %arg12[%c0_34, %c0_35] : memref<1x256xf32, #tpu.memory_space<vmem>>, vector<1x256xf32>
    %54 = vector.broadcast %53 : vector<1x256xf32> to vector<16x256xf32>
    %55 = arith.addf %52, %54 : vector<16x256xf32>
    %cst_36 = arith.constant 0.000000e+00 : f32
    %56 = vector.broadcast %cst_36 : f32 to vector<16x256xf32>
    %57 = arith.maximumf %55, %56 : vector<16x256xf32>
    %58 = arith.truncf %57 : vector<16x256xf32> to vector<16x256xbf16>
    %c0_37 = arith.constant 0 : index
    %c0_38 = arith.constant 0 : index
    %59 = vector.load %arg13[%c0_37, %c0_38] : memref<256x256xbf16, #tpu.memory_space<vmem>>, vector<256x256xbf16>
    %cst_39 = arith.constant dense<0.000000e+00> : vector<16x256xf32>
    %60 = tpu.matmul %58, %59, %cst_39 {dimension_numbers = #tpu.dot_dimension_numbers<[1], [0], [0], [1], [0, 0, 1, 1], [], []>} : vector<16x256xbf16>, vector<256x256xbf16>, vector<16x256xf32> -> vector<16x256xf32>
    %c0_40 = arith.constant 0 : index
    %c0_41 = arith.constant 0 : index
    %61 = vector.load %arg14[%c0_40, %c0_41] : memref<1x256xf32, #tpu.memory_space<vmem>>, vector<1x256xf32>
    %62 = vector.broadcast %61 : vector<1x256xf32> to vector<16x256xf32>
    %63 = arith.addf %60, %62 : vector<16x256xf32>
    %c0_42 = arith.constant 0 : index
    %c0_43 = arith.constant 0 : index
    %64 = vector.load %arg1[%c0_42, %c0_43] : memref<16x256xf32, #tpu.memory_space<vmem>>, vector<16x256xf32>
    %65 = arith.addf %64, %63 : vector<16x256xf32>
    %c0_44 = arith.constant 0 : index
    %c0_45 = arith.constant 0 : index
    %66 = vector.load %arg17[%c0_44, %c0_45] : memref<16x256xf32, #tpu.memory_space<vmem>>, vector<16x256xf32>
    tpu.vector_store %arg17[%c0_44, %c0_45], %65 {strides = array<i32>} : memref<16x256xf32, #tpu.memory_space<vmem>>, vector<16x256xf32>,
    return
  }
  func.func @transform_0(%arg0: i32) -> (i32, i32) {
    %c0_i32 = arith.constant 0 : i32
    %c0_i32_0 = arith.constant 0 : i32
    return %arg0, %c0_i32 : i32, i32
  }
  func.func @transform_1(%arg0: i32) -> (i32, i32) {
    %c0_i32 = arith.constant 0 : i32
    %c0_i32_0 = arith.constant 0 : i32
    return %arg0, %c0_i32 : i32, i32
  }
  func.func @transform_2(%arg0: i32) -> (i32, i32) {
    %c0_i32 = arith.constant 0 : i32
    %c0_i32_0 = arith.constant 0 : i32
    %c0_i32_1 = arith.constant 0 : i32
    return %c0_i32, %c0_i32_0 : i32, i32
  }
  func.func @transform_3(%arg0: i32) -> (i32, i32) {
    %c0_i32 = arith.constant 0 : i32
    %c0_i32_0 = arith.constant 0 : i32
    %c0_i32_1 = arith.constant 0 : i32
    return %c0_i32, %c0_i32_0 : i32, i32
  }
  func.func @transform_4(%arg0: i32) -> (i32, i32) {
    %c0_i32 = arith.constant 0 : i32
    %c0_i32_0 = arith.constant 0 : i32
    %c0_i32_1 = arith.constant 0 : i32
    return %c0_i32, %c0_i32_0 : i32, i32
  }
  func.func @transform_5(%arg0: i32) -> (i32, i32) {
    %c0_i32 = arith.constant 0 : i32
    %c0_i32_0 = arith.constant 0 : i32
    %c0_i32_1 = arith.constant 0 : i32
    return %c0_i32, %c0_i32_0 : i32, i32
  }
  func.func @transform_6(%arg0: i32) -> (i32, i32) {
    %c0_i32 = arith.constant 0 : i32
    %c0_i32_0 = arith.constant 0 : i32
    %c0_i32_1 = arith.constant 0 : i32
    return %c0_i32, %c0_i32_0 : i32, i32
  }
  func.func @transform_7(%arg0: i32) -> (i32, i32) {
    %c0_i32 = arith.constant 0 : i32
    %c0_i32_0 = arith.constant 0 : i32
    %c0_i32_1 = arith.constant 0 : i32
    return %c0_i32, %c0_i32_0 : i32, i32
  }
  func.func @transform_8(%arg0: i32) -> (i32, i32) {
    %c0_i32 = arith.constant 0 : i32
    %c0_i32_0 = arith.constant 0 : i32
    %c0_i32_1 = arith.constant 0 : i32
    return %c0_i32, %c0_i32_0 : i32, i32
  }
  func.func @transform_9(%arg0: i32) -> (i32, i32) {
    %c0_i32 = arith.constant 0 : i32
    %c0_i32_0 = arith.constant 0 : i32
    %c0_i32_1 = arith.constant 0 : i32
    return %c0_i32, %c0_i32_0 : i32, i32
  }
  func.func @transform_10(%arg0: i32) -> (i32, i32) {
    %c0_i32 = arith.constant 0 : i32
    %c0_i32_0 = arith.constant 0 : i32
    %c0_i32_1 = arith.constant 0 : i32
    return %c0_i32, %c0_i32_0 : i32, i32
  }
  func.func @transform_11(%arg0: i32) -> (i32, i32) {
    %c0_i32 = arith.constant 0 : i32
    %c0_i32_0 = arith.constant 0 : i32
    %c0_i32_1 = arith.constant 0 : i32
    return %c0_i32, %c0_i32_0 : i32, i32
  }
  func.func @transform_12(%arg0: i32) -> (i32, i32) {
    %c0_i32 = arith.constant 0 : i32
    %c0_i32_0 = arith.constant 0 : i32
    %c0_i32_1 = arith.constant 0 : i32
    return %c0_i32, %c0_i32_0 : i32, i32
  }
  func.func @transform_13(%arg0: i32) -> (i32, i32) {
    %c0_i32 = arith.constant 0 : i32
    %c0_i32_0 = arith.constant 0 : i32
    %c0_i32_1 = arith.constant 0 : i32
    return %c0_i32, %c0_i32_0 : i32, i32
  }
  func.func @transform_14(%arg0: i32) -> (i32, i32) {
    %c0_i32 = arith.constant 0 : i32
    %c0_i32_0 = arith.constant 0 : i32
    return %arg0, %c0_i32 : i32, i32
  }
  func.func @transform_15(%arg0: i32) -> (i32, i32) {
    %c0_i32 = arith.constant 0 : i32
    %c0_i32_0 = arith.constant 0 : i32
    return %arg0, %c0_i32 : i32, i32
  }
  func.func @transform_16(%arg0: i32) -> (i32, i32) {
    %c0_i32 = arith.constant 0 : i32
    %c0_i32_0 = arith.constant 0 : i32
    return %arg0, %c0_i32 : i32, i32
  }
}

module attributes {stable_mosaic.version = 11 : i64} {
  func.func @kernel(%arg0: i32, %arg1: memref<16x256xf32, #tpu.memory_space<vmem>>, %arg2: memref<16x128xf32, #tpu.memory_space<vmem>>, %arg3: memref<256x256xbf16, #tpu.memory_space<vmem>>, %arg4: memref<1x256xf32, #tpu.memory_space<vmem>>, %arg5: memref<256x256xbf16, #tpu.memory_space<vmem>>, %arg6: memref<1x256xf32, #tpu.memory_space<vmem>>, %arg7: memref<256x128xbf16, #tpu.memory_space<vmem>>, %arg8: memref<1x128xf32, #tpu.memory_space<vmem>>, %arg9: memref<128x256xbf16, #tpu.memory_space<vmem>>, %arg10: memref<1x256xf32, #tpu.memory_space<vmem>>, %arg11: memref<256x256xbf16, #tpu.memory_space<vmem>>, %arg12: memref<1x256xf32, #tpu.memory_space<vmem>>, %arg13: memref<256x256xbf16, #tpu.memory_space<vmem>>, %arg14: memref<1x256xf32, #tpu.memory_space<vmem>>, %arg15: memref<16x128xf32, #tpu.memory_space<vmem>>, %arg16: memref<16x128xi32, #tpu.memory_space<vmem>>, %arg17: memref<16x256xf32, #tpu.memory_space<vmem>>) attributes {dimension_semantics = [#tpu.dimension_semantics<parallel>], iteration_bounds = array<i64: 1>, scalar_prefetch = 0 : i64, scratch_operands = 0 : i64, tpu.core_type = #tpu.core_type<tc>, window_params = [{transform_indices = @transform_0, window_bounds = array<i64: 16, 256>}, {transform_indices = @transform_1, window_bounds = array<i64: 16, 128>}, {pipeline_mode = #tpu.pipeline_mode<synchronous>, transform_indices = @transform_2, window_bounds = array<i64: 256, 256>}, {pipeline_mode = #tpu.pipeline_mode<synchronous>, transform_indices = @transform_3, window_bounds = array<i64: 1, 256>}, {pipeline_mode = #tpu.pipeline_mode<synchronous>, transform_indices = @transform_4, window_bounds = array<i64: 256, 256>}, {pipeline_mode = #tpu.pipeline_mode<synchronous>, transform_indices = @transform_5, window_bounds = array<i64: 1, 256>}, {pipeline_mode = #tpu.pipeline_mode<synchronous>, transform_indices = @transform_6, window_bounds = array<i64: 256, 128>}, {pipeline_mode = #tpu.pipeline_mode<synchronous>, transform_indices = @transform_7, window_bounds = array<i64: 1, 128>}, {pipeline_mode = #tpu.pipeline_mode<synchronous>, transform_indices = @transform_8, window_bounds = array<i64: 128, 256>}, {pipeline_mode = #tpu.pipeline_mode<synchronous>, transform_indices = @transform_9, window_bounds = array<i64: 1, 256>}, {pipeline_mode = #tpu.pipeline_mode<synchronous>, transform_indices = @transform_10, window_bounds = array<i64: 256, 256>}, {pipeline_mode = #tpu.pipeline_mode<synchronous>, transform_indices = @transform_11, window_bounds = array<i64: 1, 256>}, {pipeline_mode = #tpu.pipeline_mode<synchronous>, transform_indices = @transform_12, window_bounds = array<i64: 256, 256>}, {pipeline_mode = #tpu.pipeline_mode<synchronous>, transform_indices = @transform_13, window_bounds = array<i64: 1, 256>}, {transform_indices = @transform_14, window_bounds = array<i64: 16, 128>}, {transform_indices = @transform_15, window_bounds = array<i64: 16, 128>}, {transform_indices = @transform_16, window_bounds = array<i64: 16, 256>}]} {
    %c0 = arith.constant 0 : index
    %c0_0 = arith.constant 0 : index
    %0 = vector.load %arg1[%c0, %c0_0] : memref<16x256xf32, #tpu.memory_space<vmem>>, vector<16x256xf32>
    %1 = arith.truncf %0 : vector<16x256xf32> to vector<16x256xbf16>
    %c0_1 = arith.constant 0 : index
    %c0_2 = arith.constant 0 : index
    %2 = vector.load %arg3[%c0_1, %c0_2] : memref<256x256xbf16, #tpu.memory_space<vmem>>, vector<256x256xbf16>
    %cst = arith.constant dense<0.000000e+00> : vector<16x256xf32>
    %3 = tpu.matmul %1, %2, %cst {dimension_numbers = #tpu.dot_dimension_numbers<[1], [0], [0], [1], [0, 0, 1, 1], [], []>} : vector<16x256xbf16>, vector<256x256xbf16>, vector<16x256xf32> -> vector<16x256xf32>
    %c0_3 = arith.constant 0 : index
    %c0_4 = arith.constant 0 : index
    %4 = vector.load %arg4[%c0_3, %c0_4] : memref<1x256xf32, #tpu.memory_space<vmem>>, vector<1x256xf32>
    %5 = vector.broadcast %4 : vector<1x256xf32> to vector<16x256xf32>
    %6 = arith.addf %3, %5 : vector<16x256xf32>
    %cst_5 = arith.constant 0.000000e+00 : f32
    %7 = vector.broadcast %cst_5 : f32 to vector<16x256xf32>
    %8 = arith.maximumf %6, %7 : vector<16x256xf32>
    %9 = arith.truncf %8 : vector<16x256xf32> to vector<16x256xbf16>
    %c0_6 = arith.constant 0 : index
    %c0_7 = arith.constant 0 : index
    %10 = vector.load %arg5[%c0_6, %c0_7] : memref<256x256xbf16, #tpu.memory_space<vmem>>, vector<256x256xbf16>
    %cst_8 = arith.constant dense<0.000000e+00> : vector<16x256xf32>
    %11 = tpu.matmul %9, %10, %cst_8 {dimension_numbers = #tpu.dot_dimension_numbers<[1], [0], [0], [1], [0, 0, 1, 1], [], []>} : vector<16x256xbf16>, vector<256x256xbf16>, vector<16x256xf32> -> vector<16x256xf32>
    %c0_9 = arith.constant 0 : index
    %c0_10 = arith.constant 0 : index
    %12 = vector.load %arg6[%c0_9, %c0_10] : memref<1x256xf32, #tpu.memory_space<vmem>>, vector<1x256xf32>
    %13 = vector.broadcast %12 : vector<1x256xf32> to vector<16x256xf32>
    %14 = arith.addf %11, %13 : vector<16x256xf32>
    %cst_11 = arith.constant 0.000000e+00 : f32
    %15 = vector.broadcast %cst_11 : f32 to vector<16x256xf32>
    %16 = arith.maximumf %14, %15 : vector<16x256xf32>
    %17 = arith.truncf %16 : vector<16x256xf32> to vector<16x256xbf16>
    %c0_12 = arith.constant 0 : index
    %c0_13 = arith.constant 0 : index
    %18 = vector.load %arg7[%c0_12, %c0_13] : memref<256x128xbf16, #tpu.memory_space<vmem>>, vector<256x128xbf16>
    %cst_14 = arith.constant dense<0.000000e+00> : vector<16x128xf32>
    %19 = tpu.matmul %17, %18, %cst_14 {dimension_numbers = #tpu.dot_dimension_numbers<[1], [0], [0], [1], [0, 0, 1, 1], [], []>} : vector<16x256xbf16>, vector<256x128xbf16>, vector<16x128xf32> -> vector<16x128xf32>
    %c0_15 = arith.constant 0 : index
    %c0_16 = arith.constant 0 : index
    %20 = vector.load %arg8[%c0_15, %c0_16] : memref<1x128xf32, #tpu.memory_space<vmem>>, vector<1x128xf32>
    %21 = vector.broadcast %20 : vector<1x128xf32> to vector<16x128xf32>
    %22 = arith.addf %19, %21 : vector<16x128xf32>
    %c0_17 = arith.constant 0 : index
    %c0_18 = arith.constant 0 : index
    %23 = vector.load %arg15[%c0_17, %c0_18] : memref<16x128xf32, #tpu.memory_space<vmem>>, vector<16x128xf32>
    tpu.vector_store %arg15[%c0_17, %c0_18], %22 {strides = array<i32>} : memref<16x128xf32, #tpu.memory_space<vmem>>, vector<16x128xf32>,
    %c0_19 = arith.constant 0 : index
    %c0_20 = arith.constant 0 : index
    %24 = vector.load %arg2[%c0_19, %c0_20] : memref<16x128xf32, #tpu.memory_space<vmem>>, vector<16x128xf32>
    %25 = arith.addf %22, %24 : vector<16x128xf32>
    %26 = tpu.iota {dimensions = array<i32: 1>} : vector<16x128xi32>
    %cst_21 = arith.constant dense<0xFF800000> : vector<16xf32>
    %27 = vector.multi_reduction <maximumf>, %25, %cst_21 [1] : vector<16x128xf32> to vector<16xf32>
    %28 = vector.shape_cast %27 : vector<16xf32> to vector<16x1xf32>
    %29 = vector.broadcast %28 : vector<16x1xf32> to vector<16x128xf32>
    %30 = arith.cmpf oge, %25, %29 : vector<16x128xf32>
    %c128_i32 = arith.constant 128 : i32
    %31 = vector.broadcast %c128_i32 : i32 to vector<16x128xi32>
    %32 = arith.select %30, %26, %31 : vector<16x128xi1>, vector<16x128xi32>
    %cst_22 = arith.constant dense<2147483647> : vector<16xi32>
    %33 = vector.multi_reduction <minsi>, %32, %cst_22 [1] : vector<16x128xi32> to vector<16xi32>
    %34 = vector.shape_cast %33 : vector<16xi32> to vector<16x1xi32>
    %35 = vector.shape_cast %34 : vector<16x1xi32> to vector<16x1xi32>
    %36 = vector.broadcast %35 : vector<16x1xi32> to vector<16x128xi32>
    %c0_23 = arith.constant 0 : index
    %c0_24 = arith.constant 0 : index
    %37 = vector.load %arg16[%c0_23, %c0_24] : memref<16x128xi32, #tpu.memory_space<vmem>>, vector<16x128xi32>
    tpu.vector_store %arg16[%c0_23, %c0_24], %36 {strides = array<i32>} : memref<16x128xi32, #tpu.memory_space<vmem>>, vector<16x128xi32>,
    %38 = vector.broadcast %34 : vector<16x1xi32> to vector<16x128xi32>
    %39 = arith.cmpi eq, %26, %38 : vector<16x128xi32>
    %40 = arith.extui %39 : vector<16x128xi1> to vector<16x128xi32>
    %41 = arith.sitofp %40 : vector<16x128xi32> to vector<16x128xf32>
    %42 = arith.truncf %41 : vector<16x128xf32> to vector<16x128xbf16>
    %c0_25 = arith.constant 0 : index
    %c0_26 = arith.constant 0 : index
    %43 = vector.load %arg9[%c0_25, %c0_26] : memref<128x256xbf16, #tpu.memory_space<vmem>>, vector<128x256xbf16>
    %cst_27 = arith.constant dense<0.000000e+00> : vector<16x256xf32>
    %44 = tpu.matmul %42, %43, %cst_27 {dimension_numbers = #tpu.dot_dimension_numbers<[1], [0], [0], [1], [0, 0, 1, 1], [], []>} : vector<16x128xbf16>, vector<128x256xbf16>, vector<16x256xf32> -> vector<16x256xf32>
    %c0_28 = arith.constant 0 : index
    %c0_29 = arith.constant 0 : index
    %45 = vector.load %arg10[%c0_28, %c0_29] : memref<1x256xf32, #tpu.memory_space<vmem>>, vector<1x256xf32>
    %46 = vector.broadcast %45 : vector<1x256xf32> to vector<16x256xf32>
    %47 = arith.addf %44, %46 : vector<16x256xf32>
    %cst_30 = arith.constant 0.000000e+00 : f32
    %48 = vector.broadcast %cst_30 : f32 to vector<16x256xf32>
    %49 = arith.maximumf %47, %48 : vector<16x256xf32>
    %50 = arith.truncf %49 : vector<16x256xf32> to vector<16x256xbf16>
    %c0_31 = arith.constant 0 : index
    %c0_32 = arith.constant 0 : index
    %51 = vector.load %arg11[%c0_31, %c0_32] : memref<256x256xbf16, #tpu.memory_space<vmem>>, vector<256x256xbf16>
    %cst_33 = arith.constant dense<0.000000e+00> : vector<16x256xf32>
    %52 = tpu.matmul %50, %51, %cst_33 {dimension_numbers = #tpu.dot_dimension_numbers<[1], [0], [0], [1], [0, 0, 1, 1], [], []>} : vector<16x256xbf16>, vector<256x256xbf16>, vector<16x256xf32> -> vector<16x256xf32>
    %c0_34 = arith.constant 0 : index
    %c0_35 = arith.constant 0 : index
    %53 = vector.load %arg12[%c0_34, %c0_35] : memref<1x256xf32, #tpu.memory_space<vmem>>, vector<1x256xf32>
    %54 = vector.broadcast %53 : vector<1x256xf32> to vector<16x256xf32>
    %55 = arith.addf %52, %54 : vector<16x256xf32>
    %cst_36 = arith.constant 0.000000e+00 : f32
    %56 = vector.broadcast %cst_36 : f32 to vector<16x256xf32>
    %57 = arith.maximumf %55, %56 : vector<16x256xf32>
    %58 = arith.truncf %57 : vector<16x256xf32> to vector<16x256xbf16>
    %c0_37 = arith.constant 0 : index
    %c0_38 = arith.constant 0 : index
    %59 = vector.load %arg13[%c0_37, %c0_38] : memref<256x256xbf16, #tpu.memory_space<vmem>>, vector<256x256xbf16>
    %cst_39 = arith.constant dense<0.000000e+00> : vector<16x256xf32>
    %60 = tpu.matmul %58, %59, %cst_39 {dimension_numbers = #tpu.dot_dimension_numbers<[1], [0], [0], [1], [0, 0, 1, 1], [], []>} : vector<16x256xbf16>, vector<256x256xbf16>, vector<16x256xf32> -> vector<16x256xf32>
    %c0_40 = arith.constant 0 : index
    %c0_41 = arith.constant 0 : index
    %61 = vector.load %arg14[%c0_40, %c0_41] : memref<1x256xf32, #tpu.memory_space<vmem>>, vector<1x256xf32>
    %62 = vector.broadcast %61 : vector<1x256xf32> to vector<16x256xf32>
    %63 = arith.addf %60, %62 : vector<16x256xf32>
    %c0_42 = arith.constant 0 : index
    %c0_43 = arith.constant 0 : index
    %64 = vector.load %arg1[%c0_42, %c0_43] : memref<16x256xf32, #tpu.memory_space<vmem>>, vector<16x256xf32>
    %65 = arith.addf %64, %63 : vector<16x256xf32>
    %c0_44 = arith.constant 0 : index
    %c0_45 = arith.constant 0 : index
    %66 = vector.load %arg17[%c0_44, %c0_45] : memref<16x256xf32, #tpu.memory_space<vmem>>, vector<16x256xf32>
    tpu.vector_store %arg17[%c0_44, %c0_45], %65 {strides = array<i32>} : memref<16x256xf32, #tpu.memory_space<vmem>>, vector<16x256xf32>,
    return
  }
  func.func @transform_0(%arg0: i32) -> (i32, i32) {
    %c0_i32 = arith.constant 0 : i32
    %c0_i32_0 = arith.constant 0 : i32
    return %arg0, %c0_i32 : i32, i32
  }
  func.func @transform_1(%arg0: i32) -> (i32, i32) {
    %c0_i32 = arith.constant 0 : i32
    %c0_i32_0 = arith.constant 0 : i32
    return %arg0, %c0_i32 : i32, i32
  }
  func.func @transform_2(%arg0: i32) -> (i32, i32) {
    %c0_i32 = arith.constant 0 : i32
    %c0_i32_0 = arith.constant 0 : i32
    %c0_i32_1 = arith.constant 0 : i32
    return %c0_i32, %c0_i32_0 : i32, i32
  }
  func.func @transform_3(%arg0: i32) -> (i32, i32) {
    %c0_i32 = arith.constant 0 : i32
    %c0_i32_0 = arith.constant 0 : i32
    %c0_i32_1 = arith.constant 0 : i32
    return %c0_i32, %c0_i32_0 : i32, i32
  }
  func.func @transform_4(%arg0: i32) -> (i32, i32) {
    %c0_i32 = arith.constant 0 : i32
    %c0_i32_0 = arith.constant 0 : i32
    %c0_i32_1 = arith.constant 0 : i32
    return %c0_i32, %c0_i32_0 : i32, i32
  }
  func.func @transform_5(%arg0: i32) -> (i32, i32) {
    %c0_i32 = arith.constant 0 : i32
    %c0_i32_0 = arith.constant 0 : i32
    %c0_i32_1 = arith.constant 0 : i32
    return %c0_i32, %c0_i32_0 : i32, i32
  }
  func.func @transform_6(%arg0: i32) -> (i32, i32) {
    %c0_i32 = arith.constant 0 : i32
    %c0_i32_0 = arith.constant 0 : i32
    %c0_i32_1 = arith.constant 0 : i32
    return %c0_i32, %c0_i32_0 : i32, i32
  }
  func.func @transform_7(%arg0: i32) -> (i32, i32) {
    %c0_i32 = arith.constant 0 : i32
    %c0_i32_0 = arith.constant 0 : i32
    %c0_i32_1 = arith.constant 0 : i32
    return %c0_i32, %c0_i32_0 : i32, i32
  }
  func.func @transform_8(%arg0: i32) -> (i32, i32) {
    %c0_i32 = arith.constant 0 : i32
    %c0_i32_0 = arith.constant 0 : i32
    %c0_i32_1 = arith.constant 0 : i32
    return %c0_i32, %c0_i32_0 : i32, i32
  }
  func.func @transform_9(%arg0: i32) -> (i32, i32) {
    %c0_i32 = arith.constant 0 : i32
    %c0_i32_0 = arith.constant 0 : i32
    %c0_i32_1 = arith.constant 0 : i32
    return %c0_i32, %c0_i32_0 : i32, i32
  }
  func.func @transform_10(%arg0: i32) -> (i32, i32) {
    %c0_i32 = arith.constant 0 : i32
    %c0_i32_0 = arith.constant 0 : i32
    %c0_i32_1 = arith.constant 0 : i32
    return %c0_i32, %c0_i32_0 : i32, i32
  }
  func.func @transform_11(%arg0: i32) -> (i32, i32) {
    %c0_i32 = arith.constant 0 : i32
    %c0_i32_0 = arith.constant 0 : i32
    %c0_i32_1 = arith.constant 0 : i32
    return %c0_i32, %c0_i32_0 : i32, i32
  }
  func.func @transform_12(%arg0: i32) -> (i32, i32) {
    %c0_i32 = arith.constant 0 : i32
    %c0_i32_0 = arith.constant 0 : i32
    %c0_i32_1 = arith.constant 0 : i32
    return %c0_i32, %c0_i32_0 : i32, i32
  }
  func.func @transform_13(%arg0: i32) -> (i32, i32) {
    %c0_i32 = arith.constant 0 : i32
    %c0_i32_0 = arith.constant 0 : i32
    %c0_i32_1 = arith.constant 0 : i32
    return %c0_i32, %c0_i32_0 : i32, i32
  }
  func.func @transform_14(%arg0: i32) -> (i32, i32) {
    %c0_i32 = arith.constant 0 : i32
    %c0_i32_0 = arith.constant 0 : i32
    return %arg0, %c0_i32 : i32, i32
  }
  func.func @transform_15(%arg0: i32) -> (i32, i32) {
    %c0_i32 = arith.constant 0 : i32
    %c0_i32_0 = arith.constant 0 : i32
    return %arg0, %c0_i32 : i32, i32
  }
  func.func @transform_16(%arg0: i32) -> (i32, i32) {
    %c0_i32 = arith.constant 0 : i32
    %c0_i32_0 = arith.constant 0 : i32
    return %arg0, %c0_i32 : i32, i32
  }
}

</mosaic_0001>

<bundles_post_ra>
// kernel: tpu_custom_call.1
= control target key start
LH: loop header
LB: loop body
LE: loop exit
PB: predicated region body
PF: predicated region fallthrough
CT: control target
= control target key end

     0   :  { %s2511_s0 = inlined_call_operand.hbm [shape: f32[16,256], index: 0, kind: input, shape index: {}]   ;;  %s2512_s1 = inlined_call_operand.hbm [shape: f32[16,128], index: 1, kind: input, shape index: {}]   ;;  %s2513_s2 = inlined_call_operand.hbm [shape: bf16[256,256], index: 2, kind: input, shape index: {}]   ;;  %s2514_s3 = inlined_call_operand.vmem [shape: f32[1,256], index: 3, kind: input, shape index: {}]   ;;  %s2515_s4 = inlined_call_operand.hbm [shape: bf16[256,256], index: 4, kind: input, shape index: {}]   ;;  %s2516_s5 = inlined_call_operand.vmem [shape: f32[1,256], index: 5, kind: input, shape index: {}]   ;;  %s2517_s6 = inlined_call_operand.hbm [shape: bf16[256,128], index: 6, kind: input, shape index: {}]   ;;  %s2518_s7 = inlined_call_operand.vmem [shape: f32[1,128], index: 7, kind: input, shape index: {}]   ;;  %s2519_s8 = inlined_call_operand.hbm [shape: bf16[128,256], index: 8, kind: input, shape index: {}]   ;;  %s2520_s9 = inlined_call_operand.vmem [shape: f32[1,256], index: 9, kind: input, shape index: {}]   ;;  %s2521_s10 = inlined_call_operand.hbm [shape: bf16[256,256], index: 10, kind: input, shape index: {}]   ;;  %s2522_s11 = inlined_call_operand.vmem [shape: f32[1,256], index: 11, kind: input, shape index: {}]   ;;  %s2523_s12 = inlined_call_operand.hbm [shape: bf16[256,256], index: 12, kind: input, shape index: {}]   ;;  %s2524_s13 = inlined_call_operand.vmem [shape: f32[1,256], index: 13, kind: input, shape index: {}]   ;;  %s2525_s14 = inlined_call_operand.hbm [shape: f32[16,128], index: 14, kind: output, shape index: {0}]   ;;  %s2526_s15 = inlined_call_operand.hbm [shape: s32[16,128], index: 15, kind: output, shape index: {1}]   ;;  %s2527_s16 = inlined_call_operand.hbm [shape: f32[16,256], index: 16, kind: output, shape index: {2}]  }
   0x1   :  { %2528 = sst [smem:[#allocation27_spill]] %s2511_s0 }
   0x2   :  { %22 = vsyncpa [#allocation3], 0 }
   0x3   :  { %23 = vsyncpa [#allocation6], 0 }
   0x4   :  { %24 = vsyncpa [#allocation9], 0 }
   0x5   :  { %25 = vsyncpa [#allocation12], 0 }
   0x6   :  { %26 = vsyncpa [#allocation15], 0 }
   0x7   :  { %27 = vsyncpa [#allocation4], 0 }
   0x8   :  { %28 = vsyncpa [#allocation18], 0  ;;  %s2296_s21 = smov [#allocation5]  }
   0x9   :  { %s46_s22 = sshll.u32 %s2296_s21, 4  ;;  %s47_s22 = int_to_ptr.vmem [resolvable:$true] %s46_s22 }
   0xa   :  { %s2070_s23 = scalar_lea.vmem %s47_s22, 256  ;;  %p2075_p1 = scmp.lt.s32.totalorder %s47_s22, %s47_s22 }
   0xb   :  { %p2071_p0 = scmp.ne.s32.totalorder %s47_s22, %s2070_s23  ;;  %p2076_p2 = scmp.lt.s32.totalorder %s2070_s23, %s2070_s23 }
   0xd   :  { %p2077_p3 = por %p2076_p2, %p2075_p1 }
   0xf   :  { %p2078_p4 = pnand %p2077_p3, %p2071_p0 }
  0x11   :  { %2081 = shalt.err (!%p2078_p4)
}
  0x12   :  { %s2297_s24 = smov 128   ;;  %s2298_s25 = smov 8  }
  0x13   :  { %52 = dma.hbm_to_vmem [thread:$0]  %s2512_s1, 256, %s47_s22, [#allocation6], %s2297_s24, %s2297_s24, %s2298_s25  }
  0x14   :  { %s2299_s28 = smov [#allocation8]   ;;  %s2300_s30 = smov [#allocation11]  }
  0x15   :  { %s72_s29 = sshll.u32 %s2299_s28, 4  ;;  %s100_s0 = sshll.u32 %s2300_s30, 4  ;;  %s73_s29 = int_to_ptr.vmem [resolvable:$true] %s72_s29  ;;  %s101_s0 = int_to_ptr.vmem [resolvable:$true] %s100_s0 }
  0x16   :  { %s2090_s17 = scalar_lea.vmem %s73_s29, 4096  ;;  %p2095_p6 = scmp.lt.s32.totalorder %s73_s29, %s73_s29 }
  0x17   :  { %p2091_p5 = scmp.ne.s32.totalorder %s73_s29, %s2090_s17  ;;  %p2096_p7 = scmp.lt.s32.totalorder %s2090_s17, %s2090_s17 }
  0x19   :  { %p2097_p8 = por %p2096_p7, %p2095_p6 }
  0x1b   :  { %p2098_p9 = pnand %p2097_p8, %p2091_p5 }
  0x1d   :  { %2101 = shalt.err (!%p2098_p9)
}
  0x1e   :  { %78 = dma.hbm_to_vmem [thread:$0]  %s2515_s4, 4096, %s73_s29, [#allocation9], %s2297_s24, %s2297_s24, %s2298_s25  }
  0x1f   :  { %s2110_s1 = scalar_lea.vmem %s101_s0, 2048  ;;  %p2115_p11 = scmp.lt.s32.totalorder %s101_s0, %s101_s0 }
  0x20   :  { %p2111_p10 = scmp.ne.s32.totalorder %s101_s0, %s2110_s1  ;;  %p2116_p12 = scmp.lt.s32.totalorder %s2110_s1, %s2110_s1 }
  0x22   :  { %p2117_p13 = por %p2116_p12, %p2115_p11 }
  0x24   :  { %p2118_p0 = pnand %p2117_p13, %p2111_p10 }
  0x26   :  { %2121 = shalt.err (!%p2118_p0)
}
  0x27   :  { %106 = dma.hbm_to_vmem [thread:$0]  %s2519_s8, 2048, %s101_s0, [#allocation12], %s2297_s24, %s2297_s24, %s2298_s25  }
  0x28   :  { %s2301_s22 = smov [#allocation2]  }
  0x29   :  { %s34_s23 = sshll.u32 %s2301_s22, 4  ;;  %s35_s23 = int_to_ptr.vmem [resolvable:$true] %s34_s23 }
  0x2a   :  { %s2130_s26 = scalar_lea.vmem %s35_s23, 512  ;;  %p2135_p2 = scmp.lt.s32.totalorder %s35_s23, %s35_s23 }
  0x2b   :  { %p2131_p1 = scmp.ne.s32.totalorder %s35_s23, %s2130_s26  ;;  %p2136_p3 = scmp.lt.s32.totalorder %s2130_s26, %s2130_s26 }
  0x2d   :  { %p2137_p4 = por %p2136_p3, %p2135_p2 }
  0x2f   :  { %p2138_p5 = pnand %p2137_p4, %p2131_p1 }
  0x31   :  { %2141 = shalt.err (!%p2138_p5)
}
  0x32   :  { %s2302_s4 = smov 256   ;;  %s2303_s27 = smov 16  }
  0x33   :  { %s2529_s30 = sld [smem:[#allocation27_spill]]  ;;  %s2304_s8 = smov [#allocation7]  }
  0x34   :  { %s58_s0 = sshll.u32 %s2304_s8, 4  ;;  %s2305_s17 = smov [#allocation10]   ;;  %s59_s0 = int_to_ptr.vmem [resolvable:$true] %s58_s0 }
  0x35   :  { %s86_s18 = sshll.u32 %s2305_s17, 4  ;;  %s2150_s19 = scalar_lea.vmem %s59_s0, 4096  ;;  %s87_s18 = int_to_ptr.vmem [resolvable:$true] %s86_s18 }
  0x36   :  { %p2151_p6 = scmp.ne.s32.totalorder %s59_s0, %s2150_s19  ;;  %p2155_p7 = scmp.lt.s32.totalorder %s59_s0, %s59_s0 }
  0x37   :  { %p2156_p8 = scmp.lt.s32.totalorder %s2150_s19, %s2150_s19 }
  0x39   :  { %40 = dma.hbm_to_vmem [thread:$0]  %s2529_s30, 512, %s35_s23, [#allocation3], %s2302_s4, %s2302_s4, %s2303_s27  }
  0x3a   :  { %p2157_p9 = por %p2156_p8, %p2155_p7 }
  0x3c   :  { %p2158_p10 = pnand %p2157_p9, %p2151_p6 }
  0x3e   :  { %2161 = shalt.err (!%p2158_p10)
}
  0x3f   :  { %64 = dma.hbm_to_vmem [thread:$0]  %s2513_s2, 4096, %s59_s0, [#allocation6], %s2297_s24, %s2297_s24, %s2298_s25  }
  0x40   :  { %s2170_s21 = scalar_lea.vmem %s87_s18, 2048  ;;  %p2175_p12 = scmp.lt.s32.totalorder %s87_s18, %s87_s18 }
  0x41   :  { %p2171_p11 = scmp.ne.s32.totalorder %s87_s18, %s2170_s21  ;;  %p2176_p13 = scmp.lt.s32.totalorder %s2170_s21, %s2170_s21 }
  0x43   :  { %p2177_p0 = por %p2176_p13, %p2175_p12 }
  0x45   :  { %p2178_p1 = pnand %p2177_p0, %p2171_p11 }
  0x47   :  { %2181 = shalt.err (!%p2178_p1)
}
  0x48   :  { %s2306_s22 = smov 64   ;;  %s2307_s23 = smov 4  }
  0x49   :  { %92 = dma.hbm_to_vmem [thread:$0]  %s2517_s6, 2048, %s87_s18, [#allocation9], %s2306_s22, %s2306_s22, %s2307_s23  }
  0x4a   :  { %s2308_s29 = smov [#allocation13]   ;;  %s2309_s8 = smov [#allocation14]  }
  0x4b   :  { %s114_s30 = sshll.u32 %s2308_s29, 4  ;;  %s128_s17 = sshll.u32 %s2309_s8, 4  ;;  %s115_s30 = int_to_ptr.vmem [resolvable:$true] %s114_s30  ;;  %s129_s17 = int_to_ptr.vmem [resolvable:$true] %s128_s17 }
  0x4c   :  { %s2190_s2 = scalar_lea.vmem %s115_s30, 4096  ;;  %p2195_p3 = scmp.lt.s32.totalorder %s115_s30, %s115_s30 }
  0x4d   :  { %p2191_p2 = scmp.ne.s32.totalorder %s115_s30, %s2190_s2  ;;  %p2196_p4 = scmp.lt.s32.totalorder %s2190_s2, %s2190_s2 }
  0x4f   :  { %p2197_p5 = por %p2196_p4, %p2195_p3 }
  0x51   :  { %p2198_p6 = pnand %p2197_p5, %p2191_p2 }
  0x53   :  { %2201 = shalt.err (!%p2198_p6)
}
  0x54   :  { %120 = dma.hbm_to_vmem [thread:$0]  %s2521_s10, 4096, %s115_s30, [#allocation12], %s2297_s24, %s2297_s24, %s2298_s25  }
  0x55   :  { %s2210_s6 = scalar_lea.vmem %s129_s17, 4096  ;;  %p2215_p8 = scmp.lt.s32.totalorder %s129_s17, %s129_s17 }
  0x56   :  { %p2211_p7 = scmp.ne.s32.totalorder %s129_s17, %s2210_s6  ;;  %p2216_p9 = scmp.lt.s32.totalorder %s2210_s6, %s2210_s6 }
  0x58   :  { %p2217_p10 = por %p2216_p9, %p2215_p8 }
  0x5a   :  { %p2218_p11 = pnand %p2217_p10, %p2211_p7 }
  0x5c   :  { %2221 = shalt.err (!%p2218_p11)
}
  0x5d   :  { %134 = dma.hbm_to_vmem [thread:$0]  %s2523_s12, 4096, %s129_s17, [#allocation15], %s2297_s24, %s2297_s24, %s2298_s25  }
  0x5e   :  { %2282 = dma.done.wait [#allocation3], 512  }
  0x5f   :  { %2283 = vsyncadd [#allocation3], 4294966784 }
  0x60   :  { %2284 = dma.done.wait [#allocation6], 4352  }
  0x61   :  { %2285 = vsyncadd [#allocation6], 4294962944 }
  0x62   :  { %2286 = dma.done.wait [#allocation9], 6144  }
  0x63   :  { %2287 = vsyncadd [#allocation9], 4294961152 }
  0x64   :  { %2288 = dma.done.wait [#allocation12], 6144  }
  0x65   :  { %2289 = vsyncadd [#allocation12], 4294961152 }
  0x66   :  { %2290 = dma.done.wait [#allocation15], 4096  }
  0x67   :  { %2291 = vsyncadd [#allocation15], 4294963200  ;;  %v1830_v0 = vld [vmem:[#allocation7 + $0x74] ss:$8 sps:$4 sm:$0xff]   ;;  %v1832_v1 = vld [vmem:[#allocation7 + $0x70] ss:$8 sps:$4 sm:$0xff]  }
  0x68   :  { %372 = vmatprep.subr.bf16.mxu0 %v1830_v0  ;;  %v1833_v2 = vld [vmem:[#allocation7 + $0x64] ss:$8 sps:$4 sm:$0xff]   ;;  %v1835_v3 = vld [vmem:[#allocation7 + $0x60] ss:$8 sps:$4 sm:$0xff]   ;;  %v1836_v4 = vld [vmem:[#allocation7 + $0x54] ss:$8 sps:$4 sm:$0xff]  }
  0x69   :  { %373 = vmatpush1.bf16.msra.mxu0 %v1832_v1  ;;  %v1838_v5 = vld [vmem:[#allocation7 + $0x50] ss:$8 sps:$4 sm:$0xff]   ;;  %v1839_v6 = vld [vmem:[#allocation7 + $0x44] ss:$8 sps:$4 sm:$0xff]   ;;  %v1841_v7 = vld [vmem:[#allocation7 + $0x40] ss:$8 sps:$4 sm:$0xff]  }
  0x6a   :  { %374 = vmatprep.subr.bf16.mxu0 %v1833_v2  ;;  %v1842_v8 = vld [vmem:[#allocation7 + $0x34] ss:$8 sps:$4 sm:$0xff]   ;;  %v1844_v9 = vld [vmem:[#allocation7 + $0x30] ss:$8 sps:$4 sm:$0xff]   ;;  %v1845_v10 = vld [vmem:[#allocation7 + $0x24] ss:$8 sps:$4 sm:$0xff]  }
  0x6b   :  { %v1847_v11 = vld [vmem:[#allocation7 + $0x20] ss:$8 sps:$4 sm:$0xff]   ;;  %v1848_v12 = vld [vmem:[#allocation7 + $0x14] ss:$8 sps:$4 sm:$0xff]   ;;  %v1850_v15 = vld [vmem:[#allocation7 + $0x10] ss:$8 sps:$4 sm:$0xff]  }
  0x6c   :  { %v163_v13 = vld [vmem:[#allocation2 + $0x8] sm:$0xff]  ;;  %v165_v14 = vld [vmem:[#allocation2 + $0x18] sm:$0xff]  ;;  %v162_v55 = vld [vmem:[#allocation2] sm:$0xff]  ;;  %s2313_s28 = smov [#allocation16]  }
  0x6d   :  { %375 = vmatpush1.bf16.msra.mxu0 %v1835_v3  ;;  %v1851_v16 = vld [vmem:[#allocation7 + $0x4] ss:$8 sps:$4 sm:$0xff]   ;;  %v167_v17 = vpack.c.bf16 %v165_v14, %v163_v13  ;;  %v1878_v18 = vld [vmem:[#allocation8 + $0x74] ss:$8 sps:$4 sm:$0xff]   ;;  %v1880_v19 = vld [vmem:[#allocation8 + $0x70] ss:$8 sps:$4 sm:$0xff]  }
  0x6e   :  { %376 = vmatprep.subr.bf16.mxu0 %v1836_v4  ;;  %v1881_v20 = vld [vmem:[#allocation8 + $0x64] ss:$8 sps:$4 sm:$0xff]   ;;  %625 = vmatprep.subr.bf16.mxu1 %v1878_v18  ;;  %v1883_v21 = vld [vmem:[#allocation8 + $0x60] ss:$8 sps:$4 sm:$0xff]   ;;  %v1884_v23 = vld [vmem:[#allocation8 + $0x54] ss:$8 sps:$4 sm:$0xff]  }
  0x6f   :  { %404 = vmatprep.mubr.bf16.mxu0 %v167_v17  ;;  %626 = vmatpush1.bf16.msra.mxu1 %v1880_v19  ;;  %v1853_v22 = vld [vmem:[#allocation7] ss:$8 sps:$4 sm:$0xff]   ;;  %v1854_v24 = vld [vmem:[#allocation7 + $0xf4] ss:$8 sps:$4 sm:$0xff]   ;;  %v1886_v25 = vld [vmem:[#allocation8 + $0x50] ss:$8 sps:$4 sm:$0xff]  }
  0x70   :  { %627 = vmatprep.subr.bf16.mxu1 %v1881_v20  ;;  %v1856_v26 = vld [vmem:[#allocation7 + $0xf0] ss:$8 sps:$4 sm:$0xff]   ;;  %v1887_v27 = vld [vmem:[#allocation8 + $0x44] ss:$8 sps:$4 sm:$0xff]   ;;  %v1889_v29 = vld [vmem:[#allocation8 + $0x40] ss:$8 sps:$4 sm:$0xff]  }
  0x71   :  { %377 = vmatpush1.bf16.msra.mxu0 %v1838_v5  ;;  %v1857_v28 = vld [vmem:[#allocation7 + $0xe4] ss:$8 sps:$4 sm:$0xff]   ;;  %v1859_v30 = vld [vmem:[#allocation7 + $0xe0] ss:$8 sps:$4 sm:$0xff]   ;;  %v1890_v31 = vld [vmem:[#allocation8 + $0x34] ss:$8 sps:$4 sm:$0xff]  }
  0x72   :  { %378 = vmatprep.subr.bf16.mxu0 %v1839_v6  ;;  %v1860_v32 = vld [vmem:[#allocation7 + $0xd4] ss:$8 sps:$4 sm:$0xff]   ;;  %v1862_v33 = vld [vmem:[#allocation7 + $0xd0] ss:$8 sps:$4 sm:$0xff]   ;;  %v1863_v35 = vld [vmem:[#allocation7 + $0xc4] ss:$8 sps:$4 sm:$0xff]  }
  0x73   :  { %628 = vmatpush1.bf16.msra.mxu1 %v1883_v21  ;;  %v1892_v34 = vld [vmem:[#allocation8 + $0x30] ss:$8 sps:$4 sm:$0xff]   ;;  %v1893_v36 = vld [vmem:[#allocation8 + $0x24] ss:$8 sps:$4 sm:$0xff]   ;;  %v1895_v37 = vld [vmem:[#allocation8 + $0x20] ss:$8 sps:$4 sm:$0xff]  }
  0x74   :  { %629 = vmatprep.subr.bf16.mxu1 %v1884_v23  ;;  %v1865_v38 = vld [vmem:[#allocation7 + $0xc0] ss:$8 sps:$4 sm:$0xff]   ;;  %v1896_v39 = vld [vmem:[#allocation8 + $0x14] ss:$8 sps:$4 sm:$0xff]   ;;  %v1898_v41 = vld [vmem:[#allocation8 + $0x10] ss:$8 sps:$4 sm:$0xff]  }
  0x75   :  { %379 = vmatpush1.bf16.msra.mxu0 %v1841_v7  ;;  %v1866_v40 = vld [vmem:[#allocation7 + $0xb4] ss:$8 sps:$4 sm:$0xff]   ;;  %v1868_v42 = vld [vmem:[#allocation7 + $0xb0] ss:$8 sps:$4 sm:$0xff]   ;;  %v1899_v43 = vld [vmem:[#allocation8 + $0x4] ss:$8 sps:$4 sm:$0xff]  }
  0x76   :  { %380 = vmatprep.subr.bf16.mxu0 %v1842_v8  ;;  %v1869_v44 = vld [vmem:[#allocation7 + $0xa4] ss:$8 sps:$4 sm:$0xff]   ;;  %v1901_v45 = vld [vmem:[#allocation8] ss:$8 sps:$4 sm:$0xff]   ;;  %v1902_v47 = vld [vmem:[#allocation8 + $0xf4] ss:$8 sps:$4 sm:$0xff]  }
  0x77   :  { %630 = vmatpush1.bf16.msra.mxu1 %v1886_v25  ;;  %v1871_v46 = vld [vmem:[#allocation7 + $0xa0] ss:$8 sps:$4 sm:$0xff]   ;;  %v1872_v48 = vld [vmem:[#allocation7 + $0x94] ss:$8 sps:$4 sm:$0xff]   ;;  %v1904_v49 = vld [vmem:[#allocation8 + $0xf0] ss:$8 sps:$4 sm:$0xff]  }
  0x78   :  { %631 = vmatprep.subr.bf16.mxu1 %v1887_v27  ;;  %v1874_v50 = vld [vmem:[#allocation7 + $0x90] ss:$8 sps:$4 sm:$0xff]   ;;  %v1905_v51 = vld [vmem:[#allocation8 + $0xe4] ss:$8 sps:$4 sm:$0xff]   ;;  %v1907_v53 = vld [vmem:[#allocation8 + $0xe0] ss:$8 sps:$4 sm:$0xff]  }
  0x79   :  { %381 = vmatpush1.bf16.msra.mxu0 %v1844_v9  ;;  %v1875_v52 = vld [vmem:[#allocation7 + $0x84] ss:$8 sps:$4 sm:$0xff]   ;;  %v1877_v54 = vld [vmem:[#allocation7 + $0x80] ss:$8 sps:$4 sm:$0xff]   ;;  %v1908_v57 = vld [vmem:[#allocation8 + $0xd4] ss:$8 sps:$4 sm:$0xff]  }
  0x7a   :  { %382 = vmatprep.subr.bf16.mxu0 %v1845_v10  ;;  %v164_v56 = vld [vmem:[#allocation2 + $0x10] sm:$0xff]  ;;  %v1910_v58 = vld [vmem:[#allocation8 + $0xd0] ss:$8 sps:$4 sm:$0xff]   ;;  %v1914_v62 = vld [vmem:[#allocation8 + $0xb4] ss:$8 sps:$4 sm:$0xff]   ;;  %s1577_s29 = sshll.u32 %s2313_s28, 4  ;;  %s1578_s29 = int_to_ptr.vmem [resolvable:$true] %s1577_s29 }
  0x7b   :  { %632 = vmatpush1.bf16.msra.mxu1 %v1889_v29  ;;  %v1911_v59 = vld [vmem:[#allocation8 + $0xc4] ss:$8 sps:$4 sm:$0xff]   ;;  %v166_v60 = vpack.c.bf16 %v164_v56, %v162_v55  ;;  %v1913_v61 = vld [vmem:[#allocation8 + $0xc0] ss:$8 sps:$4 sm:$0xff]   ;;  %v1916_v63 = vld [vmem:[#allocation8 + $0xb0] ss:$8 sps:$4 sm:$0xff]  }
  0x7c   :  { %633 = vmatprep.subr.bf16.mxu1 %v1890_v31  ;;  %v1917_v0 = vld [vmem:[#allocation8 + $0xa4] ss:$8 sps:$4 sm:$0xff]   ;;  %v1919_v1 = vld [vmem:[#allocation8 + $0xa0] ss:$8 sps:$4 sm:$0xff]   ;;  %v1920_v2 = vld [vmem:[#allocation8 + $0x94] ss:$8 sps:$4 sm:$0xff]  }
  0x7d   :  { %383 = vmatpush1.bf16.msra.mxu0 %v1847_v11  ;;  %v1922_v3 = vld [vmem:[#allocation8 + $0x90] ss:$8 sps:$4 sm:$0xff]   ;;  %v1923_v4 = vld [vmem:[#allocation8 + $0x84] ss:$8 sps:$4 sm:$0xff]   ;;  %v1925_v5 = vld [vmem:[#allocation8 + $0x80] ss:$8 sps:$4 sm:$0xff]  }
  0x7e   :  { %384 = vmatprep.subr.bf16.mxu0 %v1848_v12  ;;  %v1926_v6 = vld [vmem:[#allocation10 + $0x78] sm:$0xff]   ;;  %v1928_v8 = vld [vmem:[#allocation10 + $0x70] sm:$0xff]   ;;  %v1930_v10 = vld [vmem:[#allocation10 + $0x68] sm:$0xff]  }
  0x7f   :  { %634 = vmatpush1.bf16.msra.mxu1 %v1892_v34  ;;  %v1927_v7 = vld [vmem:[#allocation10 + $0x38] sm:$0xff]   ;;  %v1929_v9 = vld [vmem:[#allocation10 + $0x30] sm:$0xff]   ;;  %v1931_v11 = vld [vmem:[#allocation10 + $0x28] sm:$0xff]  }
  0x80   :  { %635 = vmatprep.subr.bf16.mxu1 %v1893_v36  ;;  %v1932_v12 = vld [vmem:[#allocation10 + $0x60] sm:$0xff]   ;;  %v1934_v14 = vld [vmem:[#allocation10 + $0x58] sm:$0xff]   ;;  %v200_v20 = vld [vmem:[%s2514_s3] sm:$0x3] }
  0x81   :  { %385 = vmatpush1.bf16.msra.mxu0 %v1850_v15  ;;  %v1933_v13 = vld [vmem:[#allocation10 + $0x20] sm:$0xff]   ;;  %v1935_v15 = vld [vmem:[#allocation10 + $0x18] sm:$0xff]  }
  0x82   :  { %386 = vmatprep.subr.bf16.mxu0 %v1851_v16  ;;  %v202_v16 = vlaneseq }
  0x83   :  { %636 = vmatpush1.bf16.msra.mxu1 %v1895_v37  ;;  %v1936_v37 = vld [vmem:[#allocation10 + $0x50] sm:$0xff]  }
  0x84   :  { %637 = vmatprep.subr.bf16.mxu1 %v1896_v39  ;;  %v203_v17 = vshrl.u32 %v202_v16, 7  ;;  %v1938_v39 = vld [vmem:[#allocation10 + $0x48] sm:$0xff]  }
  0x85   :  { %387 = vmatpush1.bf16.msra.mxu0 %v1853_v22 }
  0x86   :  { %388 = vmatprep.subr.bf16.mxu0 %v1854_v24  ;;  %v2446_v18 = vsub.s32 1, %v203_v17  ;;  %v2448_v19 = vsub.s32 0, %v203_v17 }
  0x87   :  { %638 = vmatpush1.bf16.msra.mxu1 %v1898_v41  ;;  %v1940_v41 = vld [vmem:[#allocation10 + $0x40] sm:$0xff]  }
  0x88   :  { %639 = vmatprep.subr.bf16.mxu1 %v1899_v43  ;;  %v209_v22 = vrot.slane %v200_v20, %v2446_v18  ;;  %v205_v23 = vrot.slane %v200_v20, %v2448_v19  ;;  %v453_v43 = vld [vmem:[%s2516_s5] sm:$0x3] }
  0x89   :  { %389 = vmatpush2.bf16.msra.mxu0 %v1856_v26 }
  0x8a   :  { %390 = vmatprep.subr.bf16.mxu0 %v1857_v28 }
  0x8b   :  { %640 = vmatpush1.bf16.msra.mxu1 %v1901_v45  ;;  %v462_v45 = vrot.slane %v453_v43, %v2446_v18 }
  0x8c   :  { %641 = vmatprep.subr.bf16.mxu1 %v1902_v47 }
  0x8d   :  { %391 = vmatpush2.bf16.msra.mxu0 %v1859_v30 }
  0x8e   :  { %392 = vmatprep.subr.bf16.mxu0 %v1860_v32 }
  0x8f   :  { %642 = vmatpush2.bf16.msra.mxu1 %v1904_v49 }
  0x90   :  { %643 = vmatprep.subr.bf16.mxu1 %v1905_v51 }
  0x91   :  { %393 = vmatpush2.bf16.msra.mxu0 %v1862_v33 }
  0x92   :  { %394 = vmatprep.subr.bf16.mxu0 %v1863_v35 }
  0x93   :  { %644 = vmatpush2.bf16.msra.mxu1 %v1907_v53 }
  0x94   :  { %645 = vmatprep.subr.bf16.mxu1 %v1908_v57 }
  0x95   :  { %395 = vmatpush2.bf16.msra.mxu0 %v1865_v38  ;;  %v1937_v38 = vld [vmem:[#allocation10 + $0x10] sm:$0xff]  }
  0x96   :  { %396 = vmatprep.subr.bf16.mxu0 %v1866_v40  ;;  %v1939_v40 = vld [vmem:[#allocation10 + $0x8] sm:$0xff]  }
  0x97   :  { %646 = vmatpush2.bf16.msra.mxu1 %v1910_v58 }
  0x98   :  { %647 = vmatprep.subr.bf16.mxu1 %v1911_v59 }
  0x99   :  { %397 = vmatpush2.bf16.msra.mxu0 %v1868_v42  ;;  %v1941_v42 = vld [vmem:[#allocation10] sm:$0xff]  }
  0x9a   :  { %398 = vmatprep.subr.bf16.mxu0 %v1869_v44 }
  0x9b   :  { %648 = vmatpush2.bf16.msra.mxu1 %v1913_v61  ;;  %v1688_v61 = vld [vmem:[%s2518_s7] ss:$0 sm:$0xff] }
  0x9c   :  { %649 = vmatprep.subr.bf16.mxu1 %v1914_v62 }
  0x9d   :  { %399 = vmatpush2.bf16.msra.mxu0 %v1871_v46  ;;  %v458_v46 = vrot.slane %v453_v43, %v2448_v19  ;;  %v1963_v43 = vld [vmem:[#allocation11] ss:$8 sps:$4 sm:$0xff]  }
  0x9e   :  { %400 = vmatprep.subr.bf16.mxu0 %v1872_v48 }
  0x9f   :  { %650 = vmatpush2.bf16.msra.mxu1 %v1916_v63 }
  0xa0   :  { %651 = vmatprep.subr.bf16.mxu1 %v1917_v0 }
  0xa1   :  { %401 = vmatpush2.bf16.msra.mxu0 %v1874_v50 }
  0xa2   :  { %402 = vmatprep.subr.bf16.mxu0 %v1875_v52 }
  0xa3   :  { %652 = vmatpush2.bf16.msra.mxu1 %v1919_v1  ;;  %v852_v1 = vld [vmem:[#allocation5] sm:$0xff] }
  0xa4   :  { %653 = vmatprep.subr.bf16.mxu1 %v1920_v2 }
  0xa5   :  { %403 = vmatpush2.bf16.msra.mxu0 %v1877_v54 }
  0xa6   :  { %1789 = vmatprep.subr.bf16.mxu0 %v1926_v6  ;;  %v853_v6 = vld [vmem:[#allocation5 + $0x8] sm:$0xff] }
  0xa7   :  { %654 = vmatpush2.bf16.msra.mxu1 %v1922_v3 }
  0xa8   :  { %405 = vmatmul.mubr.bf16.vlgmr.msra.gmra.mxu0 %v166_v60  ;;  %655 = vmatprep.subr.bf16.mxu1 %v1923_v4 }
  0xa9   :  { %1790 = vmatpush3.bf16.msra.mxu0 %v1927_v7 }
  0xaa   :  { %1791 = vmatprep.subr.bf16.mxu0 %v1928_v8 }
  0xab   :  { %656 = vmatpush2.bf16.msra.mxu1 %v1925_v5 }
  0xad   :  { %1792 = vmatpush3.bf16.msra.mxu0 %v1929_v9  ;;  %v2464_v9 = vand.u32 127, %v202_v16  ;;  %v1945_v16 = vld [vmem:[#allocation11 + $0x60] ss:$8 sps:$4 sm:$0xff]  }
  0xae   :  { %1793 = vmatprep.subr.bf16.mxu0 %v1930_v10 }
  0xb1   :  { %1794 = vmatpush3.bf16.msra.mxu0 %v1931_v11 }
  0xb2   :  { %1795 = vmatprep.subr.bf16.mxu0 %v1932_v12 }
  0xb5   :  { %1796 = vmatpush3.bf16.msra.mxu0 %v1933_v13 }
  0xb6   :  { %1797 = vmatprep.subr.bf16.mxu0 %v1934_v14 }
  0xb9   :  { %1798 = vmatpush3.bf16.msra.mxu0 %v1935_v15 }
  0xba   :  { %1799 = vmatprep.subr.bf16.mxu0 %v1936_v37 }
  0xbd   :  { %1800 = vmatpush3.bf16.msra.mxu0 %v1937_v38 }
  0xbe   :  { %1801 = vmatprep.subr.bf16.mxu0 %v1938_v39 }
  0xc1   :  { %1802 = vmatpush3.bf16.msra.mxu0 %v1939_v40  ;;  %v1962_v40 = vld [vmem:[#allocation11 + $0x14] ss:$8 sps:$4 sm:$0xff]  }
  0xc2   :  { %1803 = vmatprep.subr.bf16.mxu0 %v1940_v41  ;;  %v1960_v41 = vld [vmem:[#allocation11 + $0x10] ss:$8 sps:$4 sm:$0xff]  }
  0xc5   :  { %1804 = vmatpush3.bf16.msra.mxu0 %v1941_v42  ;;  %v1965_v42 = vld [vmem:[#allocation11 + $0x4] ss:$8 sps:$4 sm:$0xff]  }
 0x168   :  { %v406_v21 = vpop.f32.mrf.mxu0 }
 0x169   :  { %v407_v28 = vadd.f32 %v406_v21, %v205_v23  ;;  %v1942_v21 = vld [vmem:[#allocation11 + $0x70] ss:$8 sps:$4 sm:$0xff]  }
 0x16a   :  { %v408_v24 = vpop.f32.mrf.mxu0 }
 0x16b   :  { %v409_v26 = vadd.f32 %v408_v24, %v209_v22  ;;  %v415_v34 = vmax.f32 %v407_v28, 0.0  ;;  %v1950_v24 = vld [vmem:[#allocation11 + $0x54] ss:$8 sps:$4 sm:$0xff]  }
 0x16c   :  { %v410_v25 = vpop.f32.mrf.mxu0  ;;  %v1956_v28 = vld [vmem:[#allocation11 + $0x34] ss:$8 sps:$4 sm:$0xff]  }
 0x16d   :  { %v411_v27 = vadd.f32 %v410_v25, %v205_v23  ;;  %v416_v32 = vmax.f32 %v409_v26, 0.0  ;;  %v1947_v23 = vld [vmem:[#allocation11 + $0x64] ss:$8 sps:$4 sm:$0xff]   ;;  %v1948_v25 = vld [vmem:[#allocation11 + $0x50] ss:$8 sps:$4 sm:$0xff]  }
 0x16e   :  { %v412_v29 = vpop.f32.mrf.mxu0  ;;  %v1953_v26 = vld [vmem:[#allocation11 + $0x44] ss:$8 sps:$4 sm:$0xff]  }
 0x16f   :  { %v413_v30 = vadd.f32 %v412_v29, %v209_v22  ;;  %v417_v31 = vmax.f32 %v411_v27, 0.0  ;;  %v1944_v22 = vld [vmem:[#allocation11 + $0x74] ss:$8 sps:$4 sm:$0xff]   ;;  %v1951_v27 = vld [vmem:[#allocation11 + $0x40] ss:$8 sps:$4 sm:$0xff]  }
 0x170   :  { %1011 = vmatprep.subr.bf16.mxu1 %v1944_v22  ;;  %v1954_v29 = vld [vmem:[#allocation11 + $0x30] ss:$8 sps:$4 sm:$0xff]   ;;  %v2007_v22 = vld [vmem:[#allocation13 + $0xa4] ss:$8 sps:$4 sm:$0xff]  }
 0x171   :  { %v418_v33 = vmax.f32 %v413_v30, 0.0  ;;  %v419_v36 = vpack.c.bf16 %v417_v31, %v415_v34  ;;  %v1959_v30 = vld [vmem:[#allocation11 + $0x24] ss:$8 sps:$4 sm:$0xff]   ;;  %v1957_v31 = vld [vmem:[#allocation11 + $0x20] ss:$8 sps:$4 sm:$0xff]  }
 0x173   :  { %v420_v35 = vpack.c.bf16 %v418_v33, %v416_v32 }
 0x175   :  { %657 = vmatprep.mubr.bf16.mxu1 %v420_v35 }
 0x176   :  { %658 = vmatmul.mubr.bf16.vlgmr.msra.gmra.mxu1 %v419_v36 }
 0x177   :  { %1012 = vmatpush1.bf16.msra.mxu1 %v1942_v21  ;;  %v2311_v21 = vmov 1.0|1.0  }
 0x178   :  { %1013 = vmatprep.subr.bf16.mxu1 %v1947_v23  ;;  %v2005_v23 = vld [vmem:[#allocation13 + $0xa0] ss:$8 sps:$4 sm:$0xff]  }
 0x17b   :  { %1014 = vmatpush1.bf16.msra.mxu1 %v1945_v16  ;;  %v2010_v16 = vld [vmem:[#allocation13 + $0x94] ss:$8 sps:$4 sm:$0xff]  }
 0x17c   :  { %1015 = vmatprep.subr.bf16.mxu1 %v1950_v24  ;;  %v2008_v24 = vld [vmem:[#allocation13 + $0x90] ss:$8 sps:$4 sm:$0xff]  }
 0x17f   :  { %1016 = vmatpush1.bf16.msra.mxu1 %v1948_v25  ;;  %v2013_v25 = vld [vmem:[#allocation13 + $0x84] ss:$8 sps:$4 sm:$0xff]  }
 0x180   :  { %1017 = vmatprep.subr.bf16.mxu1 %v1953_v26  ;;  %v2011_v26 = vld [vmem:[#allocation13 + $0x80] ss:$8 sps:$4 sm:$0xff]  }
 0x183   :  { %1018 = vmatpush1.bf16.msra.mxu1 %v1951_v27  ;;  %v2014_v27 = vld [vmem:[#allocation14 + $0x70] ss:$8 sps:$4 sm:$0xff]  }
 0x184   :  { %1019 = vmatprep.subr.bf16.mxu1 %v1956_v28  ;;  %v2016_v28 = vld [vmem:[#allocation14 + $0x74] ss:$8 sps:$4 sm:$0xff]  }
 0x187   :  { %1020 = vmatpush1.bf16.msra.mxu1 %v1954_v29  ;;  %v2019_v29 = vld [vmem:[#allocation14 + $0x64] ss:$8 sps:$4 sm:$0xff]  }
 0x188   :  { %1021 = vmatprep.subr.bf16.mxu1 %v1959_v30  ;;  %v2022_v30 = vld [vmem:[#allocation14 + $0x54] ss:$8 sps:$4 sm:$0xff]  }
 0x18b   :  { %1022 = vmatpush1.bf16.msra.mxu1 %v1957_v31  ;;  %v2020_v31 = vld [vmem:[#allocation14 + $0x50] ss:$8 sps:$4 sm:$0xff]  }
 0x18c   :  { %1023 = vmatprep.subr.bf16.mxu1 %v1962_v40  ;;  %v2037_v40 = vld [vmem:[#allocation14 + $0x4] ss:$8 sps:$4 sm:$0xff]  }
 0x18f   :  { %1024 = vmatpush1.bf16.msra.mxu1 %v1960_v41  ;;  %v2035_v41 = vld [vmem:[#allocation14] ss:$8 sps:$4 sm:$0xff]  }
 0x190   :  { %1025 = vmatprep.subr.bf16.mxu1 %v1965_v42  ;;  %v2040_v42 = vld [vmem:[#allocation14 + $0xf4] ss:$8 sps:$4 sm:$0xff]  }
 0x193   :  { %1026 = vmatpush1.bf16.msra.mxu1 %v1963_v43  ;;  %v2038_v43 = vld [vmem:[#allocation14 + $0xf0] ss:$8 sps:$4 sm:$0xff]  }
 0x194   :  { %1517 = vmatprep.subr.bf16.mxu1 %v2016_v28 }
 0x236   :  { %v659_v44 = vpop.f32.mrf.mxu1 }
 0x237   :  { %v660_v51 = vadd.f32 %v659_v44, %v458_v46  ;;  %v2310_v44 = vmov 0  }
 0x238   :  { %v661_v47 = vpop.f32.mrf.mxu1  ;;  %1043 = vmatprep.mubr.bf16.mxu1 %v2310_v44  ;;  %v2043_v44 = vld [vmem:[#allocation14 + $0xe4] ss:$8 sps:$4 sm:$0xff]  }
 0x239   :  { %v662_v49 = vadd.f32 %v661_v47, %v462_v45  ;;  %v668_v57 = vmax.f32 %v660_v51, 0.0  ;;  %v1971_v47 = vld [vmem:[#allocation13 + $0x64] ss:$8 sps:$4 sm:$0xff]  }
 0x23a   :  { %v663_v48 = vpop.f32.mrf.mxu1  ;;  %v1977_v51 = vld [vmem:[#allocation13 + $0x44] ss:$8 sps:$4 sm:$0xff]  }
 0x23b   :  { %v664_v50 = vadd.f32 %v663_v48, %v458_v46  ;;  %v669_v55 = vmax.f32 %v662_v49, 0.0  ;;  %v1968_v46 = vld [vmem:[#allocation13 + $0x74] ss:$8 sps:$4 sm:$0xff]   ;;  %v1969_v48 = vld [vmem:[#allocation13 + $0x60] ss:$8 sps:$4 sm:$0xff]  }
 0x23c   :  { %v665_v52 = vpop.f32.mrf.mxu1  ;;  %1264 = vmatprep.subr.bf16.mxu0 %v1968_v46  ;;  %v1974_v49 = vld [vmem:[#allocation13 + $0x54] ss:$8 sps:$4 sm:$0xff]  }
 0x23d   :  { %v666_v53 = vadd.f32 %v665_v52, %v462_v45  ;;  %v670_v54 = vmax.f32 %v664_v50, 0.0  ;;  %v1966_v45 = vld [vmem:[#allocation13 + $0x70] ss:$8 sps:$4 sm:$0xff]   ;;  %v1975_v52 = vld [vmem:[#allocation13 + $0x40] ss:$8 sps:$4 sm:$0xff]  }
 0x23e   :  { %v1972_v50 = vld [vmem:[#allocation13 + $0x50] ss:$8 sps:$4 sm:$0xff]   ;;  %v2046_v46 = vld [vmem:[#allocation14 + $0xd4] ss:$8 sps:$4 sm:$0xff]  }
 0x23f   :  { %v671_v56 = vmax.f32 %v666_v53, 0.0  ;;  %v672_v59 = vpack.c.bf16 %v670_v54, %v668_v57  ;;  %v1980_v53 = vld [vmem:[#allocation13 + $0x34] ss:$8 sps:$4 sm:$0xff]   ;;  %v1978_v54 = vld [vmem:[#allocation13 + $0x30] ss:$8 sps:$4 sm:$0xff]  }
 0x240   :  { %v1986_v57 = vld [vmem:[#allocation13 + $0x14] ss:$8 sps:$4 sm:$0xff]  }
 0x241   :  { %v673_v58 = vpack.c.bf16 %v671_v56, %v669_v55  ;;  %v1983_v55 = vld [vmem:[#allocation13 + $0x24] ss:$8 sps:$4 sm:$0xff]   ;;  %v1981_v56 = vld [vmem:[#allocation13 + $0x20] ss:$8 sps:$4 sm:$0xff]  }
 0x243   :  { %841 = vmatprep.mubr.bf16.mxu0 %v673_v58  ;;  %v1984_v58 = vld [vmem:[#allocation13 + $0x10] ss:$8 sps:$4 sm:$0xff]  }
 0x244   :  { %842 = vmatmul.mubr.bf16.vlgmr.msra.gmra.mxu0 %v672_v59  ;;  %v1989_v59 = vld [vmem:[#allocation13 + $0x4] ss:$8 sps:$4 sm:$0xff]  }
 0x245   :  { %1265 = vmatpush1.bf16.msra.mxu0 %v1966_v45  ;;  %v2041_v45 = vld [vmem:[#allocation14 + $0xe0] ss:$8 sps:$4 sm:$0xff]  }
 0x246   :  { %1266 = vmatprep.subr.bf16.mxu0 %v1971_v47  ;;  %v2044_v47 = vld [vmem:[#allocation14 + $0xd0] ss:$8 sps:$4 sm:$0xff]  }
 0x249   :  { %1267 = vmatpush1.bf16.msra.mxu0 %v1969_v48  ;;  %v2049_v48 = vld [vmem:[#allocation14 + $0xc4] ss:$8 sps:$4 sm:$0xff]  }
 0x24a   :  { %1268 = vmatprep.subr.bf16.mxu0 %v1974_v49  ;;  %v2047_v49 = vld [vmem:[#allocation14 + $0xc0] ss:$8 sps:$4 sm:$0xff]  }
 0x24d   :  { %1269 = vmatpush1.bf16.msra.mxu0 %v1972_v50  ;;  %v2052_v50 = vld [vmem:[#allocation14 + $0xb4] ss:$8 sps:$4 sm:$0xff]  }
 0x24e   :  { %1270 = vmatprep.subr.bf16.mxu0 %v1977_v51  ;;  %v2050_v51 = vld [vmem:[#allocation14 + $0xb0] ss:$8 sps:$4 sm:$0xff]  }
 0x251   :  { %1271 = vmatpush1.bf16.msra.mxu0 %v1975_v52  ;;  %v919_v52 = vld [vmem:[%s2520_s9] sm:$0x3] }
 0x252   :  { %1272 = vmatprep.subr.bf16.mxu0 %v1980_v53 }
 0x255   :  { %1273 = vmatpush1.bf16.msra.mxu0 %v1978_v54  ;;  %v928_v54 = vrot.slane %v919_v52, %v2446_v18 }
 0x256   :  { %1274 = vmatprep.subr.bf16.mxu0 %v1983_v55  ;;  %v924_v55 = vrot.slane %v919_v52, %v2448_v19 }
 0x259   :  { %1275 = vmatpush1.bf16.msra.mxu0 %v1981_v56 }
 0x25a   :  { %1276 = vmatprep.subr.bf16.mxu0 %v1986_v57 }
 0x25d   :  { %1277 = vmatpush1.bf16.msra.mxu0 %v1984_v58 }
 0x25e   :  { %1278 = vmatprep.subr.bf16.mxu0 %v1989_v59 }
 0x304   :  { %v1805_v60 = vpop.f32.mrf.mxu0 }
 0x306   :  { %v1806_v62 = vpop.f32.mrf.mxu0 }
 0x307   :  { %v1807_v63 = vadd.f32 %v1806_v62, %v1805_v60  ;;  %v1987_v60 = vld [vmem:[#allocation13] ss:$8 sps:$4 sm:$0xff]   ;;  %v1990_v62 = vld [vmem:[#allocation13 + $0xf0] ss:$8 sps:$4 sm:$0xff]  }
 0x308   :  { %v1808_v0 = vpop.f32.mrf.mxu0  ;;  %1279 = vmatpush1.bf16.msra.mxu0 %v1987_v60 }
 0x309   :  { %v844_v2 = vadd.f32 %v1807_v63, %v1688_v61  ;;  %v1995_v63 = vld [vmem:[#allocation13 + $0xe4] ss:$8 sps:$4 sm:$0xff]  }
 0x30a   :  { %v1809_v3 = vpop.f32.mrf.mxu0 }
 0x30b   :  { %850 = vst [vmem:[#allocation16] sm:$0xff] %v844_v2  ;;  %v1810_v4 = vadd.f32 %v1809_v3, %v1808_v0  ;;  %v854_v5 = vadd.f32 %v852_v1, %v844_v2  ;;  %v1993_v0 = vld [vmem:[#allocation13 + $0xe0] ss:$8 sps:$4 sm:$0xff]   ;;  %v1998_v1 = vld [vmem:[#allocation13 + $0xd4] ss:$8 sps:$4 sm:$0xff]  }
 0x30c   :  { %v1996_v2 = vld [vmem:[#allocation13 + $0xd0] ss:$8 sps:$4 sm:$0xff]   ;;  %v2001_v3 = vld [vmem:[#allocation13 + $0xc4] ss:$8 sps:$4 sm:$0xff]  }
 0x30d   :  { %v847_v7 = vadd.f32 %v1810_v4, %v1688_v61  ;;  %858 = vmax.xlane.f32.xlu0 %v854_v5  ;;  %v1992_v61 = vld [vmem:[#allocation13 + $0xf4] ss:$8 sps:$4 sm:$0xff]   ;;  %v1999_v4 = vld [vmem:[#allocation13 + $0xc0] ss:$8 sps:$4 sm:$0xff]  }
 0x30e   :  { %1280 = vmatprep.subr.bf16.mxu0 %v1992_v61 }
 0x30f   :  { %851 = vst [vmem:[#allocation16 + $0x8] sm:$0xff] %v847_v7  ;;  %v855_v8 = vadd.f32 %v853_v6, %v847_v7  ;;  %1281 = vmatpush2.bf16.msra.mxu0 %v1990_v62  ;;  %v2002_v6 = vld [vmem:[#allocation13 + $0xb0] ss:$8 sps:$4 sm:$0xff]  }
 0x310   :  { %1282 = vmatprep.subr.bf16.mxu0 %v1995_v63 }
 0x311   :  { %860 = vmax.xlane.f32.xlu0 %v855_v8 }
 0x313   :  { %1283 = vmatpush2.bf16.msra.mxu0 %v1993_v0 }
 0x314   :  { %1284 = vmatprep.subr.bf16.mxu0 %v1998_v1 }
 0x317   :  { %1285 = vmatpush2.bf16.msra.mxu0 %v1996_v2 }
 0x318   :  { %1286 = vmatprep.subr.bf16.mxu0 %v2001_v3 }
 0x31b   :  { %1287 = vmatpush2.bf16.msra.mxu0 %v1999_v4 }
 0x396   :  { %v859_v10 = vpop.xlane.xlu0 %858 }
 0x397   :  { %vm862_vm0 = vcmp.ge.f32.partialorder %v854_v5, %v859_v10  ;;  %v2004_v5 = vld [vmem:[#allocation13 + $0xb4] ss:$8 sps:$4 sm:$0xff]  }
 0x398   :  { %v864_v11 = vsel %vm862_vm0, %v2464_v9, 128  ;;  %1288 = vmatprep.subr.bf16.mxu0 %v2004_v5  ;;  %v2055_v5 = vld [vmem:[#allocation14 + $0xa4] ss:$8 sps:$4 sm:$0xff]  }
 0x399   :  { %v867_v12 = vshra.s32 %v864_v11, 16  ;;  %v866_v32 = vand.u32 65535, %v864_v11  ;;  %1289 = vmatpush2.bf16.msra.mxu0 %v2002_v6  ;;  %v2053_v6 = vld [vmem:[#allocation14 + $0xa0] ss:$8 sps:$4 sm:$0xff]  }
 0x39a   :  { %v861_v13 = vpop.xlane.xlu0 %860  ;;  %1290 = vmatprep.subr.bf16.mxu0 %v2007_v22 }
 0x39b   :  { %vm863_vm1 = vcmp.ge.f32.partialorder %v855_v8, %v861_v13  ;;  %v869_v14 = vcvt.s32.f32 %v867_v12  ;;  %v868_v35 = vcvt.s32.f32 %v866_v32  ;;  %v2025_v32 = vld [vmem:[#allocation14 + $0x44] ss:$8 sps:$4 sm:$0xff]  }
 0x39c   :  { %v865_v15 = vsel %vm863_vm1, %v2464_v9, 128 }
 0x39d   :  { %870 = vmin.xlane.f32.xlu1 %v869_v14  ;;  %v881_v17 = vshra.s32 %v865_v15, 16  ;;  %v880_v33 = vand.u32 65535, %v865_v15  ;;  %1291 = vmatpush2.bf16.msra.mxu0 %v2005_v23 }
 0x39e   :  { %1292 = vmatprep.subr.bf16.mxu0 %v2010_v16 }
 0x39f   :  { %v883_v20 = vcvt.s32.f32 %v881_v17  ;;  %v882_v38 = vcvt.s32.f32 %v880_v33  ;;  %v2023_v33 = vld [vmem:[#allocation14 + $0x40] ss:$8 sps:$4 sm:$0xff]  }
 0x3a1   :  { %884 = vmin.xlane.f32.xlu1 %v883_v20  ;;  %1293 = vmatpush2.bf16.msra.mxu0 %v2008_v24 }
 0x3a2   :  { %1294 = vmatprep.subr.bf16.mxu0 %v2013_v25 }
 0x3a5   :  { %1295 = vmatpush2.bf16.msra.mxu0 %v2011_v26 }
 0x426   :  { %v2468_v34 = vpop.xlane.xlu1 %870 }
 0x427   :  { %vm872_vm2 = vcmp.eq.f32.partialorder %v869_v14, %v2468_v34  ;;  %v877_v7 = vcvt.f32.s32 %v2468_v34  ;;  %v2028_v34 = vld [vmem:[#allocation14 + $0x34] ss:$8 sps:$4 sm:$0xff]  }
 0x428   :  { %v873_v36 = vsel %vm872_vm2, %v868_v35, inf  ;;  %v2026_v35 = vld [vmem:[#allocation14 + $0x30] ss:$8 sps:$4 sm:$0xff]  }
 0x429   :  { %874 = vmin.xlane.f32.xlu0 %v873_v36  ;;  %v878_v10 = vshll.u32 %v877_v7, 16  ;;  %v2031_v36 = vld [vmem:[#allocation14 + $0x24] ss:$8 sps:$4 sm:$0xff]   ;;  %v2058_v7 = vld [vmem:[#allocation14 + $0x94] ss:$8 sps:$4 sm:$0xff]  }
 0x42a   :  { %v2471_v37 = vpop.xlane.xlu1 %884 }
 0x42b   :  { %vm886_vm3 = vcmp.eq.f32.partialorder %v883_v20, %v2471_v37  ;;  %v891_v11 = vcvt.f32.s32 %v2471_v37  ;;  %v2029_v37 = vld [vmem:[#allocation14 + $0x20] ss:$8 sps:$4 sm:$0xff]  }
 0x42c   :  { %v887_v39 = vsel %vm886_vm3, %v882_v38, inf  ;;  %v2034_v38 = vld [vmem:[#allocation14 + $0x14] ss:$8 sps:$4 sm:$0xff]  }
 0x42d   :  { %888 = vmin.xlane.f32.xlu1 %v887_v39  ;;  %v892_v15 = vshll.u32 %v891_v11, 16  ;;  %v2032_v39 = vld [vmem:[#allocation14 + $0x10] ss:$8 sps:$4 sm:$0xff]   ;;  %v2059_v11 = vld [vmem:[#allocation14 + $0x80] ss:$8 sps:$4 sm:$0xff]  }
 0x4b2   :  { %v875_v8 = vpop.xlane.xlu0 %874 }
 0x4b3   :  { %v876_v12 = vcvt.f32.s32 %v875_v8  ;;  %v2056_v8 = vld [vmem:[#allocation14 + $0x90] ss:$8 sps:$4 sm:$0xff]  }
 0x4b5   :  { %v879_v13 = vadd.s32 %v878_v10, %v876_v12  ;;  %v2061_v10 = vld [vmem:[#allocation14 + $0x84] ss:$8 sps:$4 sm:$0xff]   ;;  %v1092_v12 = vld [vmem:[%s2522_s11] sm:$0x3]  ;;  %s2312_s11 = smov [#allocation17]  }
 0x4b6   :  { %v889_v14 = vpop.xlane.xlu1 %888  ;;  %s1589_s26 = sshll.u32 %s2312_s11, 4  ;;  %s1590_s26 = int_to_ptr.vmem [resolvable:$true] %s1589_s26 }
 0x4b7   :  { %894 = vst [vmem:[#allocation17] sm:$0xff] %v879_v13  ;;  %v890_v17 = vcvt.f32.s32 %v889_v14  ;;  %vm896_vm4 = vcmp.eq.s32.totalorder %v2464_v9, %v879_v13  ;;  %v1101_v14 = vrot.slane %v1092_v12, %v2446_v18  ;;  %s2222_s30 = scalar_lea.vmem %s1590_s26, 256  ;;  %p2227_p13 = scmp.lt.s32.totalorder %s1590_s26, %s1590_s26 }
 0x4b8   :  { %p2223_p12 = scmp.ne.s32.totalorder %s1590_s26, %s2222_s30  ;;  %p2228_p0 = scmp.lt.s32.totalorder %s2222_s30, %s2222_s30 }
 0x4b9   :  { %v893_v20 = vadd.s32 %v892_v15, %v890_v17  ;;  %v1097_v15 = vrot.slane %v1092_v12, %v2448_v19 }
 0x4ba   :  { %p2229_p1 = por %p2228_p0, %p2227_p13 }
 0x4bb   :  { %vm897_vm5 = vcmp.eq.s32.totalorder %v2464_v9, %v893_v20  ;;  %895 = vst [vmem:[#allocation17 + $0x8] sm:$0xff] %v893_v20  ;;  %v2017_v9 = vld [vmem:[#allocation14 + $0x60] ss:$8 sps:$4 sm:$0xff]  }
 0x4bc   :  { %vm1723_vm6 = vmpackc.low %vm897_vm5, %vm896_vm4  ;;  %p2230_p2 = pnand %p2229_p1, %p2223_p12 }
 0x4bd   :  { %1724 = vmatmul.mubr.msk.bf16.vlgmr.msra.gmra.mxu1 %vm1723_vm6, %v2311_v21 }
 0x4be   :  { %1518 = vmatpush1.bf16.msra.mxu1 %v2014_v27 }
 0x4bf   :  { %1519 = vmatprep.subr.bf16.mxu1 %v2019_v29 }
 0x4c2   :  { %1520 = vmatpush1.bf16.msra.mxu1 %v2017_v9 }
 0x4c3   :  { %1521 = vmatprep.subr.bf16.mxu1 %v2022_v30 }
 0x4c6   :  { %1522 = vmatpush1.bf16.msra.mxu1 %v2020_v31 }
 0x4c7   :  { %1523 = vmatprep.subr.bf16.mxu1 %v2025_v32 }
 0x4ca   :  { %1524 = vmatpush1.bf16.msra.mxu1 %v2023_v33 }
 0x4cb   :  { %1525 = vmatprep.subr.bf16.mxu1 %v2028_v34 }
 0x4ce   :  { %1526 = vmatpush1.bf16.msra.mxu1 %v2026_v35 }
 0x4cf   :  { %1527 = vmatprep.subr.bf16.mxu1 %v2031_v36 }
 0x4d2   :  { %1528 = vmatpush1.bf16.msra.mxu1 %v2029_v37 }
 0x4d3   :  { %1529 = vmatprep.subr.bf16.mxu1 %v2034_v38 }
 0x4d6   :  { %1530 = vmatpush1.bf16.msra.mxu1 %v2032_v39 }
 0x4d7   :  { %1531 = vmatprep.subr.bf16.mxu1 %v2037_v40 }
 0x4da   :  { %1532 = vmatpush1.bf16.msra.mxu1 %v2035_v41 }
 0x4db   :  { %1533 = vmatprep.subr.bf16.mxu1 %v2040_v42 }
 0x4de   :  { %1534 = vmatpush2.bf16.msra.mxu1 %v2038_v43 }
 0x4df   :  { %1535 = vmatprep.subr.bf16.mxu1 %v2043_v44 }
 0x4e2   :  { %1536 = vmatpush2.bf16.msra.mxu1 %v2041_v45 }
 0x4e3   :  { %1537 = vmatprep.subr.bf16.mxu1 %v2046_v46 }
 0x4e6   :  { %1538 = vmatpush2.bf16.msra.mxu1 %v2044_v47 }
 0x4e7   :  { %1539 = vmatprep.subr.bf16.mxu1 %v2049_v48 }
 0x4ea   :  { %1540 = vmatpush2.bf16.msra.mxu1 %v2047_v49 }
 0x4eb   :  { %1541 = vmatprep.subr.bf16.mxu1 %v2052_v50 }
 0x4ee   :  { %1542 = vmatpush2.bf16.msra.mxu1 %v2050_v51 }
 0x4ef   :  { %1543 = vmatprep.subr.bf16.mxu1 %v2055_v5 }
 0x4f2   :  { %1544 = vmatpush2.bf16.msra.mxu1 %v2053_v6 }
 0x4f3   :  { %1545 = vmatprep.subr.bf16.mxu1 %v2058_v7 }
 0x4f6   :  { %1546 = vmatpush2.bf16.msra.mxu1 %v2056_v8 }
 0x4f7   :  { %1547 = vmatprep.subr.bf16.mxu1 %v2061_v10 }
 0x4fa   :  { %1548 = vmatpush2.bf16.msra.mxu1 %v2059_v11 }
 0x57d   :  { %v1045_v53 = vpop.f32.mrf.mxu1 }
 0x57e   :  { %v1046_v60 = vadd.f32 %v1045_v53, %v924_v55 }
 0x57f   :  { %v1047_v56 = vpop.f32.mrf.mxu1 }
 0x580   :  { %v1048_v58 = vadd.f32 %v1047_v56, %v928_v54  ;;  %v1054_v2 = vmax.f32 %v1046_v60, 0.0 }
 0x581   :  { %v1049_v57 = vpop.f32.mrf.mxu1 }
 0x582   :  { %v1050_v59 = vadd.f32 %v1049_v57, %v924_v55  ;;  %v1055_v0 = vmax.f32 %v1048_v58, 0.0 }
 0x583   :  { %v1051_v61 = vpop.f32.mrf.mxu1 }
 0x584   :  { %v1052_v62 = vadd.f32 %v1051_v61, %v928_v54  ;;  %v1056_v63 = vmax.f32 %v1050_v59, 0.0 }
 0x586   :  { %v1057_v1 = vmax.f32 %v1052_v62, 0.0  ;;  %v1058_v4 = vpack.c.bf16 %v1056_v63, %v1054_v2 }
 0x588   :  { %v1059_v3 = vpack.c.bf16 %v1057_v1, %v1055_v0 }
 0x58a   :  { %1296 = vmatprep.mubr.bf16.mxu0 %v1059_v3 }
 0x58b   :  { %1297 = vmatmul.mubr.bf16.vlgmr.msra.gmra.mxu0 %v1058_v4 }
 0x64b   :  { %v1298_v13 = vpop.f32.mrf.mxu0 }
 0x64c   :  { %v1299_v23 = vadd.f32 %v1298_v13, %v1097_v15 }
 0x64d   :  { %v1300_v17 = vpop.f32.mrf.mxu0 }
 0x64e   :  { %v1301_v21 = vadd.f32 %v1300_v17, %v1101_v14  ;;  %v1307_v28 = vmax.f32 %v1299_v23, 0.0 }
 0x64f   :  { %v1302_v20 = vpop.f32.mrf.mxu0 }
 0x650   :  { %v1303_v22 = vadd.f32 %v1302_v20, %v1097_v15  ;;  %v1308_v26 = vmax.f32 %v1301_v21, 0.0 }
 0x651   :  { %v1304_v16 = vpop.f32.mrf.mxu0 }
 0x652   :  { %v1305_v24 = vadd.f32 %v1304_v16, %v1101_v14  ;;  %v1309_v25 = vmax.f32 %v1303_v22, 0.0 }
 0x654   :  { %v1310_v27 = vmax.f32 %v1305_v24, 0.0  ;;  %v1311_v9 = vpack.c.bf16 %v1309_v25, %v1307_v28 }
 0x656   :  { %v1312_v29 = vpack.c.bf16 %v1310_v27, %v1308_v26 }
 0x658   :  { %1549 = vmatprep.mubr.bf16.mxu1 %v1312_v29 }
 0x659   :  { %1550 = vmatmul.mubr.bf16.vlgmr.msra.gmra.mxu1 %v1311_v9 }
 0x65a   :  { %2233 = shalt.err (!%p2230_p2)
}
 0x65b   :  { %1595 = dma.vmem_to_hbm [thread:$0]  %s1590_s26, 256, %s2526_s15, [#allocation18], %s2297_s24, %s2297_s24, %s2298_s25  }
 0x65c   :  { %s2242_s2 = scalar_lea.vmem %s1578_s29, 256  ;;  %p2247_p4 = scmp.lt.s32.totalorder %s1578_s29, %s1578_s29 }
 0x65d   :  { %p2243_p3 = scmp.ne.s32.totalorder %s1578_s29, %s2242_s2  ;;  %p2248_p5 = scmp.lt.s32.totalorder %s2242_s2, %s2242_s2 }
 0x65f   :  { %p2249_p6 = por %p2248_p5, %p2247_p4 }
 0x661   :  { %p2250_p7 = pnand %p2249_p6, %p2243_p3 }
 0x663   :  { %2253 = shalt.err (!%p2250_p7)
}
 0x664   :  { %1583 = dma.vmem_to_hbm [thread:$0]  %s1578_s29, 256, %s2525_s14, [#allocation4], %s2297_s24, %s2297_s24, %s2298_s25   ;;  %v1560_v34 = vld [vmem:[#allocation2] sm:$0xff]  ;;  %v1561_v37 = vld [vmem:[#allocation2 + $0x8] sm:$0xff]  ;;  %v1562_v41 = vld [vmem:[#allocation2 + $0x10] sm:$0xff] }
 0x665   :  { %v1345_v30 = vld [vmem:[%s2524_s13] sm:$0x3]  ;;  %v1563_v45 = vld [vmem:[#allocation2 + $0x18] sm:$0xff]  ;;  %s2314_s14 = smov [#allocation19]  }
 0x666   :  { %v1350_v31 = vrot.slane %v1345_v30, %v2448_v19  ;;  %v1354_v32 = vrot.slane %v1345_v30, %v2446_v18  ;;  %s1601_s13 = sshll.u32 %s2314_s14, 4  ;;  %s1602_s13 = int_to_ptr.vmem [resolvable:$true] %s1601_s13 }
 0x667   :  { %s2262_s15 = scalar_lea.vmem %s1602_s13, 512  ;;  %p2267_p9 = scmp.lt.s32.totalorder %s1602_s13, %s1602_s13 }
 0x668   :  { %p2263_p8 = scmp.ne.s32.totalorder %s1602_s13, %s2262_s15  ;;  %p2268_p10 = scmp.lt.s32.totalorder %s2262_s15, %s2262_s15 }
 0x66a   :  { %p2269_p11 = por %p2268_p10, %p2267_p9 }
 0x66c   :  { %p2270_p12 = pnand %p2269_p11, %p2263_p8 }
 0x719   :  { %v1551_v33 = vpop.f32.mrf.mxu1 }
 0x71a   :  { %v1552_v35 = vadd.f32 %v1551_v33, %v1350_v31 }
 0x71b   :  { %v1553_v36 = vpop.f32.mrf.mxu1 }
 0x71c   :  { %v1564_v38 = vadd.f32 %v1560_v34, %v1552_v35  ;;  %v1554_v39 = vadd.f32 %v1553_v36, %v1354_v32 }
 0x71d   :  { %v1555_v40 = vpop.f32.mrf.mxu1 }
 0x71e   :  { %1568 = vst [vmem:[#allocation19] sm:$0xff] %v1564_v38  ;;  %v1565_v42 = vadd.f32 %v1561_v37, %v1554_v39  ;;  %v1556_v43 = vadd.f32 %v1555_v40, %v1350_v31 }
 0x71f   :  { %v1557_v44 = vpop.f32.mrf.mxu1 }
 0x720   :  { %1569 = vst [vmem:[#allocation19 + $0x8] sm:$0xff] %v1565_v42  ;;  %v1566_v19 = vadd.f32 %v1562_v41, %v1556_v43  ;;  %v1558_v46 = vadd.f32 %v1557_v44, %v1354_v32 }
 0x722   :  { %1570 = vst [vmem:[#allocation19 + $0x10] sm:$0xff] %v1566_v19  ;;  %v1567_v18 = vadd.f32 %v1563_v45, %v1558_v46 }
 0x724   :  { %1571 = vst [vmem:[#allocation19 + $0x18] sm:$0xff] %v1567_v18 }
 0x725   :  { %2273 = shalt.err (!%p2270_p12)
}
 0x726   :  { %1607 = dma.vmem_to_hbm [thread:$0]  %s1602_s13, 512, %s2527_s16, [#allocation18], %s2302_s4, %s2302_s4, %s2303_s27  }
 0x727   :  { %2292 = dma.done.wait [#allocation4], 256  }
 0x728   :  { %2293 = vsyncadd [#allocation4], 4294967040 }
 0x729   :  { %2294 = dma.done.wait [#allocation18], 768  }
 0x72a   :  { %2295 = vsyncadd [#allocation18], 4294966528 }
 0x72b   :  { %1617 = vsyncpa [#allocation3], 1 }
 0x72c   :  { %1618 = vsyncpa [#allocation6], 1 }
 0x72d   :  { %1619 = vsyncpa [#allocation9], 1 }
 0x72e   :  { %1620 = vsyncpa [#allocation12], 1 }
 0x72f   :  { %1621 = vsyncpa [#allocation15], 1 }
 0x730   :  { %1622 = vsyncpa [#allocation4], 1 }
 0x731   :  { %1623 = vsyncpa [#allocation18], 1 }

// kernel: tpu_custom_call.1
= control target key start
LH: loop header
LB: loop body
LE: loop exit
PB: predicated region body
PF: predicated region fallthrough
CT: control target
= control target key end

     0   :  { %s2511_s0 = inlined_call_operand.hbm [shape: f32[16,256], index: 0, kind: input, shape index: {}]   ;;  %s2512_s1 = inlined_call_operand.hbm [shape: f32[16,128], index: 1, kind: input, shape index: {}]   ;;  %s2513_s2 = inlined_call_operand.hbm [shape: bf16[256,256], index: 2, kind: input, shape index: {}]   ;;  %s2514_s3 = inlined_call_operand.vmem [shape: f32[1,256], index: 3, kind: input, shape index: {}]   ;;  %s2515_s4 = inlined_call_operand.hbm [shape: bf16[256,256], index: 4, kind: input, shape index: {}]   ;;  %s2516_s5 = inlined_call_operand.vmem [shape: f32[1,256], index: 5, kind: input, shape index: {}]   ;;  %s2517_s6 = inlined_call_operand.hbm [shape: bf16[256,128], index: 6, kind: input, shape index: {}]   ;;  %s2518_s7 = inlined_call_operand.vmem [shape: f32[1,128], index: 7, kind: input, shape index: {}]   ;;  %s2519_s8 = inlined_call_operand.hbm [shape: bf16[128,256], index: 8, kind: input, shape index: {}]   ;;  %s2520_s9 = inlined_call_operand.vmem [shape: f32[1,256], index: 9, kind: input, shape index: {}]   ;;  %s2521_s10 = inlined_call_operand.hbm [shape: bf16[256,256], index: 10, kind: input, shape index: {}]   ;;  %s2522_s11 = inlined_call_operand.vmem [shape: f32[1,256], index: 11, kind: input, shape index: {}]   ;;  %s2523_s12 = inlined_call_operand.hbm [shape: bf16[256,256], index: 12, kind: input, shape index: {}]   ;;  %s2524_s13 = inlined_call_operand.vmem [shape: f32[1,256], index: 13, kind: input, shape index: {}]   ;;  %s2525_s14 = inlined_call_operand.hbm [shape: f32[16,128], index: 14, kind: output, shape index: {0}]   ;;  %s2526_s15 = inlined_call_operand.hbm [shape: s32[16,128], index: 15, kind: output, shape index: {1}]   ;;  %s2527_s16 = inlined_call_operand.hbm [shape: f32[16,256], index: 16, kind: output, shape index: {2}]  }
   0x1   :  { %2528 = sst [smem:[#allocation27_spill]] %s2511_s0 }
   0x2   :  { %22 = vsyncpa [#allocation3], 0 }
   0x3   :  { %23 = vsyncpa [#allocation6], 0 }
   0x4   :  { %24 = vsyncpa [#allocation9], 0 }
   0x5   :  { %25 = vsyncpa [#allocation12], 0 }
   0x6   :  { %26 = vsyncpa [#allocation15], 0 }
   0x7   :  { %27 = vsyncpa [#allocation4], 0 }
   0x8   :  { %28 = vsyncpa [#allocation18], 0  ;;  %s2296_s21 = smov [#allocation5]  }
   0x9   :  { %s46_s22 = sshll.u32 %s2296_s21, 4  ;;  %s47_s22 = int_to_ptr.vmem [resolvable:$true] %s46_s22 }
   0xa   :  { %s2070_s23 = scalar_lea.vmem %s47_s22, 256  ;;  %p2075_p1 = scmp.lt.s32.totalorder %s47_s22, %s47_s22 }
   0xb   :  { %p2071_p0 = scmp.ne.s32.totalorder %s47_s22, %s2070_s23  ;;  %p2076_p2 = scmp.lt.s32.totalorder %s2070_s23, %s2070_s23 }
   0xd   :  { %p2077_p3 = por %p2076_p2, %p2075_p1 }
   0xf   :  { %p2078_p4 = pnand %p2077_p3, %p2071_p0 }
  0x11   :  { %2081 = shalt.err (!%p2078_p4)
}
  0x12   :  { %s2297_s24 = smov 128   ;;  %s2298_s25 = smov 8  }
  0x13   :  { %52 = dma.hbm_to_vmem [thread:$0]  %s2512_s1, 256, %s47_s22, [#allocation6], %s2297_s24, %s2297_s24, %s2298_s25  }
  0x14   :  { %s2299_s28 = smov [#allocation8]   ;;  %s2300_s30 = smov [#allocation11]  }
  0x15   :  { %s72_s29 = sshll.u32 %s2299_s28, 4  ;;  %s100_s0 = sshll.u32 %s2300_s30, 4  ;;  %s73_s29 = int_to_ptr.vmem [resolvable:$true] %s72_s29  ;;  %s101_s0 = int_to_ptr.vmem [resolvable:$true] %s100_s0 }
  0x16   :  { %s2090_s17 = scalar_lea.vmem %s73_s29, 4096  ;;  %p2095_p6 = scmp.lt.s32.totalorder %s73_s29, %s73_s29 }
  0x17   :  { %p2091_p5 = scmp.ne.s32.totalorder %s73_s29, %s2090_s17  ;;  %p2096_p7 = scmp.lt.s32.totalorder %s2090_s17, %s2090_s17 }
  0x19   :  { %p2097_p8 = por %p2096_p7, %p2095_p6 }
  0x1b   :  { %p2098_p9 = pnand %p2097_p8, %p2091_p5 }
  0x1d   :  { %2101 = shalt.err (!%p2098_p9)
}
  0x1e   :  { %78 = dma.hbm_to_vmem [thread:$0]  %s2515_s4, 4096, %s73_s29, [#allocation9], %s2297_s24, %s2297_s24, %s2298_s25  }
  0x1f   :  { %s2110_s1 = scalar_lea.vmem %s101_s0, 2048  ;;  %p2115_p11 = scmp.lt.s32.totalorder %s101_s0, %s101_s0 }
  0x20   :  { %p2111_p10 = scmp.ne.s32.totalorder %s101_s0, %s2110_s1  ;;  %p2116_p12 = scmp.lt.s32.totalorder %s2110_s1, %s2110_s1 }
  0x22   :  { %p2117_p13 = por %p2116_p12, %p2115_p11 }
  0x24   :  { %p2118_p0 = pnand %p2117_p13, %p2111_p10 }
  0x26   :  { %2121 = shalt.err (!%p2118_p0)
}
  0x27   :  { %106 = dma.hbm_to_vmem [thread:$0]  %s2519_s8, 2048, %s101_s0, [#allocation12], %s2297_s24, %s2297_s24, %s2298_s25  }
  0x28   :  { %s2301_s22 = smov [#allocation2]  }
  0x29   :  { %s34_s23 = sshll.u32 %s2301_s22, 4  ;;  %s35_s23 = int_to_ptr.vmem [resolvable:$true] %s34_s23 }
  0x2a   :  { %s2130_s26 = scalar_lea.vmem %s35_s23, 512  ;;  %p2135_p2 = scmp.lt.s32.totalorder %s35_s23, %s35_s23 }
  0x2b   :  { %p2131_p1 = scmp.ne.s32.totalorder %s35_s23, %s2130_s26  ;;  %p2136_p3 = scmp.lt.s32.totalorder %s2130_s26, %s2130_s26 }
  0x2d   :  { %p2137_p4 = por %p2136_p3, %p2135_p2 }
  0x2f   :  { %p2138_p5 = pnand %p2137_p4, %p2131_p1 }
  0x31   :  { %2141 = shalt.err (!%p2138_p5)
}
  0x32   :  { %s2302_s4 = smov 256   ;;  %s2303_s27 = smov 16  }
  0x33   :  { %s2529_s30 = sld [smem:[#allocation27_spill]]  ;;  %s2304_s8 = smov [#allocation7]  }
  0x34   :  { %s58_s0 = sshll.u32 %s2304_s8, 4  ;;  %s2305_s17 = smov [#allocation10]   ;;  %s59_s0 = int_to_ptr.vmem [resolvable:$true] %s58_s0 }
  0x35   :  { %s86_s18 = sshll.u32 %s2305_s17, 4  ;;  %s2150_s19 = scalar_lea.vmem %s59_s0, 4096  ;;  %s87_s18 = int_to_ptr.vmem [resolvable:$true] %s86_s18 }
  0x36   :  { %p2151_p6 = scmp.ne.s32.totalorder %s59_s0, %s2150_s19  ;;  %p2155_p7 = scmp.lt.s32.totalorder %s59_s0, %s59_s0 }
  0x37   :  { %p2156_p8 = scmp.lt.s32.totalorder %s2150_s19, %s2150_s19 }
  0x39   :  { %40 = dma.hbm_to_vmem [thread:$0]  %s2529_s30, 512, %s35_s23, [#allocation3], %s2302_s4, %s2302_s4, %s2303_s27  }
  0x3a   :  { %p2157_p9 = por %p2156_p8, %p2155_p7 }
  0x3c   :  { %p2158_p10 = pnand %p2157_p9, %p2151_p6 }
  0x3e   :  { %2161 = shalt.err (!%p2158_p10)
}
  0x3f   :  { %64 = dma.hbm_to_vmem [thread:$0]  %s2513_s2, 4096, %s59_s0, [#allocation6], %s2297_s24, %s2297_s24, %s2298_s25  }
  0x40   :  { %s2170_s21 = scalar_lea.vmem %s87_s18, 2048  ;;  %p2175_p12 = scmp.lt.s32.totalorder %s87_s18, %s87_s18 }
  0x41   :  { %p2171_p11 = scmp.ne.s32.totalorder %s87_s18, %s2170_s21  ;;  %p2176_p13 = scmp.lt.s32.totalorder %s2170_s21, %s2170_s21 }
  0x43   :  { %p2177_p0 = por %p2176_p13, %p2175_p12 }
  0x45   :  { %p2178_p1 = pnand %p2177_p0, %p2171_p11 }
  0x47   :  { %2181 = shalt.err (!%p2178_p1)
}
  0x48   :  { %s2306_s22 = smov 64   ;;  %s2307_s23 = smov 4  }
  0x49   :  { %92 = dma.hbm_to_vmem [thread:$0]  %s2517_s6, 2048, %s87_s18, [#allocation9], %s2306_s22, %s2306_s22, %s2307_s23  }
  0x4a   :  { %s2308_s29 = smov [#allocation13]   ;;  %s2309_s8 = smov [#allocation14]  }
  0x4b   :  { %s114_s30 = sshll.u32 %s2308_s29, 4  ;;  %s128_s17 = sshll.u32 %s2309_s8, 4  ;;  %s115_s30 = int_to_ptr.vmem [resolvable:$true] %s114_s30  ;;  %s129_s17 = int_to_ptr.vmem [resolvable:$true] %s128_s17 }
  0x4c   :  { %s2190_s2 = scalar_lea.vmem %s115_s30, 4096  ;;  %p2195_p3 = scmp.lt.s32.totalorder %s115_s30, %s115_s30 }
  0x4d   :  { %p2191_p2 = scmp.ne.s32.totalorder %s115_s30, %s2190_s2  ;;  %p2196_p4 = scmp.lt.s32.totalorder %s2190_s2, %s2190_s2 }
  0x4f   :  { %p2197_p5 = por %p2196_p4, %p2195_p3 }
  0x51   :  { %p2198_p6 = pnand %p2197_p5, %p2191_p2 }
  0x53   :  { %2201 = shalt.err (!%p2198_p6)
}
  0x54   :  { %120 = dma.hbm_to_vmem [thread:$0]  %s2521_s10, 4096, %s115_s30, [#allocation12], %s2297_s24, %s2297_s24, %s2298_s25  }
  0x55   :  { %s2210_s6 = scalar_lea.vmem %s129_s17, 4096  ;;  %p2215_p8 = scmp.lt.s32.totalorder %s129_s17, %s129_s17 }
  0x56   :  { %p2211_p7 = scmp.ne.s32.totalorder %s129_s17, %s2210_s6  ;;  %p2216_p9 = scmp.lt.s32.totalorder %s2210_s6, %s2210_s6 }
  0x58   :  { %p2217_p10 = por %p2216_p9, %p2215_p8 }
  0x5a   :  { %p2218_p11 = pnand %p2217_p10, %p2211_p7 }
  0x5c   :  { %2221 = shalt.err (!%p2218_p11)
}
  0x5d   :  { %134 = dma.hbm_to_vmem [thread:$0]  %s2523_s12, 4096, %s129_s17, [#allocation15], %s2297_s24, %s2297_s24, %s2298_s25  }
  0x5e   :  { %2282 = dma.done.wait [#allocation3], 512  }
  0x5f   :  { %2283 = vsyncadd [#allocation3], 4294966784 }
  0x60   :  { %2284 = dma.done.wait [#allocation6], 4352  }
  0x61   :  { %2285 = vsyncadd [#allocation6], 4294962944 }
  0x62   :  { %2286 = dma.done.wait [#allocation9], 6144  }
  0x63   :  { %2287 = vsyncadd [#allocation9], 4294961152 }
  0x64   :  { %2288 = dma.done.wait [#allocation12], 6144  }
  0x65   :  { %2289 = vsyncadd [#allocation12], 4294961152 }
  0x66   :  { %2290 = dma.done.wait [#allocation15], 4096  }
  0x67   :  { %2291 = vsyncadd [#allocation15], 4294963200  ;;  %v1830_v0 = vld [vmem:[#allocation7 + $0x74] ss:$8 sps:$4 sm:$0xff]   ;;  %v1832_v1 = vld [vmem:[#allocation7 + $0x70] ss:$8 sps:$4 sm:$0xff]  }
  0x68   :  { %372 = vmatprep.subr.bf16.mxu0 %v1830_v0  ;;  %v1833_v2 = vld [vmem:[#allocation7 + $0x64] ss:$8 sps:$4 sm:$0xff]   ;;  %v1835_v3 = vld [vmem:[#allocation7 + $0x60] ss:$8 sps:$4 sm:$0xff]   ;;  %v1836_v4 = vld [vmem:[#allocation7 + $0x54] ss:$8 sps:$4 sm:$0xff]  }
  0x69   :  { %373 = vmatpush1.bf16.msra.mxu0 %v1832_v1  ;;  %v1838_v5 = vld [vmem:[#allocation7 + $0x50] ss:$8 sps:$4 sm:$0xff]   ;;  %v1839_v6 = vld [vmem:[#allocation7 + $0x44] ss:$8 sps:$4 sm:$0xff]   ;;  %v1841_v7 = vld [vmem:[#allocation7 + $0x40] ss:$8 sps:$4 sm:$0xff]  }
  0x6a   :  { %374 = vmatprep.subr.bf16.mxu0 %v1833_v2  ;;  %v1842_v8 = vld [vmem:[#allocation7 + $0x34] ss:$8 sps:$4 sm:$0xff]   ;;  %v1844_v9 = vld [vmem:[#allocation7 + $0x30] ss:$8 sps:$4 sm:$0xff]   ;;  %v1845_v10 = vld [vmem:[#allocation7 + $0x24] ss:$8 sps:$4 sm:$0xff]  }
  0x6b   :  { %v1847_v11 = vld [vmem:[#allocation7 + $0x20] ss:$8 sps:$4 sm:$0xff]   ;;  %v1848_v12 = vld [vmem:[#allocation7 + $0x14] ss:$8 sps:$4 sm:$0xff]   ;;  %v1850_v15 = vld [vmem:[#allocation7 + $0x10] ss:$8 sps:$4 sm:$0xff]  }
  0x6c   :  { %v163_v13 = vld [vmem:[#allocation2 + $0x8] sm:$0xff]  ;;  %v165_v14 = vld [vmem:[#allocation2 + $0x18] sm:$0xff]  ;;  %v162_v55 = vld [vmem:[#allocation2] sm:$0xff]  ;;  %s2313_s28 = smov [#allocation16]  }
  0x6d   :  { %375 = vmatpush1.bf16.msra.mxu0 %v1835_v3  ;;  %v1851_v16 = vld [vmem:[#allocation7 + $0x4] ss:$8 sps:$4 sm:$0xff]   ;;  %v167_v17 = vpack.c.bf16 %v165_v14, %v163_v13  ;;  %v1878_v18 = vld [vmem:[#allocation8 + $0x74] ss:$8 sps:$4 sm:$0xff]   ;;  %v1880_v19 = vld [vmem:[#allocation8 + $0x70] ss:$8 sps:$4 sm:$0xff]  }
  0x6e   :  { %376 = vmatprep.subr.bf16.mxu0 %v1836_v4  ;;  %v1881_v20 = vld [vmem:[#allocation8 + $0x64] ss:$8 sps:$4 sm:$0xff]   ;;  %625 = vmatprep.subr.bf16.mxu1 %v1878_v18  ;;  %v1883_v21 = vld [vmem:[#allocation8 + $0x60] ss:$8 sps:$4 sm:$0xff]   ;;  %v1884_v23 = vld [vmem:[#allocation8 + $0x54] ss:$8 sps:$4 sm:$0xff]  }
  0x6f   :  { %404 = vmatprep.mubr.bf16.mxu0 %v167_v17  ;;  %626 = vmatpush1.bf16.msra.mxu1 %v1880_v19  ;;  %v1853_v22 = vld [vmem:[#allocation7] ss:$8 sps:$4 sm:$0xff]   ;;  %v1854_v24 = vld [vmem:[#allocation7 + $0xf4] ss:$8 sps:$4 sm:$0xff]   ;;  %v1886_v25 = vld [vmem:[#allocation8 + $0x50] ss:$8 sps:$4 sm:$0xff]  }
  0x70   :  { %627 = vmatprep.subr.bf16.mxu1 %v1881_v20  ;;  %v1856_v26 = vld [vmem:[#allocation7 + $0xf0] ss:$8 sps:$4 sm:$0xff]   ;;  %v1887_v27 = vld [vmem:[#allocation8 + $0x44] ss:$8 sps:$4 sm:$0xff]   ;;  %v1889_v29 = vld [vmem:[#allocation8 + $0x40] ss:$8 sps:$4 sm:$0xff]  }
  0x71   :  { %377 = vmatpush1.bf16.msra.mxu0 %v1838_v5  ;;  %v1857_v28 = vld [vmem:[#allocation7 + $0xe4] ss:$8 sps:$4 sm:$0xff]   ;;  %v1859_v30 = vld [vmem:[#allocation7 + $0xe0] ss:$8 sps:$4 sm:$0xff]   ;;  %v1890_v31 = vld [vmem:[#allocation8 + $0x34] ss:$8 sps:$4 sm:$0xff]  }
  0x72   :  { %378 = vmatprep.subr.bf16.mxu0 %v1839_v6  ;;  %v1860_v32 = vld [vmem:[#allocation7 + $0xd4] ss:$8 sps:$4 sm:$0xff]   ;;  %v1862_v33 = vld [vmem:[#allocation7 + $0xd0] ss:$8 sps:$4 sm:$0xff]   ;;  %v1863_v35 = vld [vmem:[#allocation7 + $0xc4] ss:$8 sps:$4 sm:$0xff]  }
  0x73   :  { %628 = vmatpush1.bf16.msra.mxu1 %v1883_v21  ;;  %v1892_v34 = vld [vmem:[#allocation8 + $0x30] ss:$8 sps:$4 sm:$0xff]   ;;  %v1893_v36 = vld [vmem:[#allocation8 + $0x24] ss:$8 sps:$4 sm:$0xff]   ;;  %v1895_v37 = vld [vmem:[#allocation8 + $0x20] ss:$8 sps:$4 sm:$0xff]  }
  0x74   :  { %629 = vmatprep.subr.bf16.mxu1 %v1884_v23  ;;  %v1865_v38 = vld [vmem:[#allocation7 + $0xc0] ss:$8 sps:$4 sm:$0xff]   ;;  %v1896_v39 = vld [vmem:[#allocation8 + $0x14] ss:$8 sps:$4 sm:$0xff]   ;;  %v1898_v41 = vld [vmem:[#allocation8 + $0x10] ss:$8 sps:$4 sm:$0xff]  }
  0x75   :  { %379 = vmatpush1.bf16.msra.mxu0 %v1841_v7  ;;  %v1866_v40 = vld [vmem:[#allocation7 + $0xb4] ss:$8 sps:$4 sm:$0xff]   ;;  %v1868_v42 = vld [vmem:[#allocation7 + $0xb0] ss:$8 sps:$4 sm:$0xff]   ;;  %v1899_v43 = vld [vmem:[#allocation8 + $0x4] ss:$8 sps:$4 sm:$0xff]  }
  0x76   :  { %380 = vmatprep.subr.bf16.mxu0 %v1842_v8  ;;  %v1869_v44 = vld [vmem:[#allocation7 + $0xa4] ss:$8 sps:$4 sm:$0xff]   ;;  %v1901_v45 = vld [vmem:[#allocation8] ss:$8 sps:$4 sm:$0xff]   ;;  %v1902_v47 = vld [vmem:[#allocation8 + $0xf4] ss:$8 sps:$4 sm:$0xff]  }
  0x77   :  { %630 = vmatpush1.bf16.msra.mxu1 %v1886_v25  ;;  %v1871_v46 = vld [vmem:[#allocation7 + $0xa0] ss:$8 sps:$4 sm:$0xff]   ;;  %v1872_v48 = vld [vmem:[#allocation7 + $0x94] ss:$8 sps:$4 sm:$0xff]   ;;  %v1904_v49 = vld [vmem:[#allocation8 + $0xf0] ss:$8 sps:$4 sm:$0xff]  }
  0x78   :  { %631 = vmatprep.subr.bf16.mxu1 %v1887_v27  ;;  %v1874_v50 = vld [vmem:[#allocation7 + $0x90] ss:$8 sps:$4 sm:$0xff]   ;;  %v1905_v51 = vld [vmem:[#allocation8 + $0xe4] ss:$8 sps:$4 sm:$0xff]   ;;  %v1907_v53 = vld [vmem:[#allocation8 + $0xe0] ss:$8 sps:$4 sm:$0xff]  }
  0x79   :  { %381 = vmatpush1.bf16.msra.mxu0 %v1844_v9  ;;  %v1875_v52 = vld [vmem:[#allocation7 + $0x84] ss:$8 sps:$4 sm:$0xff]   ;;  %v1877_v54 = vld [vmem:[#allocation7 + $0x80] ss:$8 sps:$4 sm:$0xff]   ;;  %v1908_v57 = vld [vmem:[#allocation8 + $0xd4] ss:$8 sps:$4 sm:$0xff]  }
  0x7a   :  { %382 = vmatprep.subr.bf16.mxu0 %v1845_v10  ;;  %v164_v56 = vld [vmem:[#allocation2 + $0x10] sm:$0xff]  ;;  %v1910_v58 = vld [vmem:[#allocation8 + $0xd0] ss:$8 sps:$4 sm:$0xff]   ;;  %v1914_v62 = vld [vmem:[#allocation8 + $0xb4] ss:$8 sps:$4 sm:$0xff]   ;;  %s1577_s29 = sshll.u32 %s2313_s28, 4  ;;  %s1578_s29 = int_to_ptr.vmem [resolvable:$true] %s1577_s29 }
  0x7b   :  { %632 = vmatpush1.bf16.msra.mxu1 %v1889_v29  ;;  %v1911_v59 = vld [vmem:[#allocation8 + $0xc4] ss:$8 sps:$4 sm:$0xff]   ;;  %v166_v60 = vpack.c.bf16 %v164_v56, %v162_v55  ;;  %v1913_v61 = vld [vmem:[#allocation8 + $0xc0] ss:$8 sps:$4 sm:$0xff]   ;;  %v1916_v63 = vld [vmem:[#allocation8 + $0xb0] ss:$8 sps:$4 sm:$0xff]  }
  0x7c   :  { %633 = vmatprep.subr.bf16.mxu1 %v1890_v31  ;;  %v1917_v0 = vld [vmem:[#allocation8 + $0xa4] ss:$8 sps:$4 sm:$0xff]   ;;  %v1919_v1 = vld [vmem:[#allocation8 + $0xa0] ss:$8 sps:$4 sm:$0xff]   ;;  %v1920_v2 = vld [vmem:[#allocation8 + $0x94] ss:$8 sps:$4 sm:$0xff]  }
  0x7d   :  { %383 = vmatpush1.bf16.msra.mxu0 %v1847_v11  ;;  %v1922_v3 = vld [vmem:[#allocation8 + $0x90] ss:$8 sps:$4 sm:$0xff]   ;;  %v1923_v4 = vld [vmem:[#allocation8 + $0x84] ss:$8 sps:$4 sm:$0xff]   ;;  %v1925_v5 = vld [vmem:[#allocation8 + $0x80] ss:$8 sps:$4 sm:$0xff]  }
  0x7e   :  { %384 = vmatprep.subr.bf16.mxu0 %v1848_v12  ;;  %v1926_v6 = vld [vmem:[#allocation10 + $0x78] sm:$0xff]   ;;  %v1928_v8 = vld [vmem:[#allocation10 + $0x70] sm:$0xff]   ;;  %v1930_v10 = vld [vmem:[#allocation10 + $0x68] sm:$0xff]  }
  0x7f   :  { %634 = vmatpush1.bf16.msra.mxu1 %v1892_v34  ;;  %v1927_v7 = vld [vmem:[#allocation10 + $0x38] sm:$0xff]   ;;  %v1929_v9 = vld [vmem:[#allocation10 + $0x30] sm:$0xff]   ;;  %v1931_v11 = vld [vmem:[#allocation10 + $0x28] sm:$0xff]  }
  0x80   :  { %635 = vmatprep.subr.bf16.mxu1 %v1893_v36  ;;  %v1932_v12 = vld [vmem:[#allocation10 + $0x60] sm:$0xff]   ;;  %v1934_v14 = vld [vmem:[#allocation10 + $0x58] sm:$0xff]   ;;  %v200_v20 = vld [vmem:[%s2514_s3] sm:$0x3] }
  0x81   :  { %385 = vmatpush1.bf16.msra.mxu0 %v1850_v15  ;;  %v1933_v13 = vld [vmem:[#allocation10 + $0x20] sm:$0xff]   ;;  %v1935_v15 = vld [vmem:[#allocation10 + $0x18] sm:$0xff]  }
  0x82   :  { %386 = vmatprep.subr.bf16.mxu0 %v1851_v16  ;;  %v202_v16 = vlaneseq }
  0x83   :  { %636 = vmatpush1.bf16.msra.mxu1 %v1895_v37  ;;  %v1936_v37 = vld [vmem:[#allocation10 + $0x50] sm:$0xff]  }
  0x84   :  { %637 = vmatprep.subr.bf16.mxu1 %v1896_v39  ;;  %v203_v17 = vshrl.u32 %v202_v16, 7  ;;  %v1938_v39 = vld [vmem:[#allocation10 + $0x48] sm:$0xff]  }
  0x85   :  { %387 = vmatpush1.bf16.msra.mxu0 %v1853_v22 }
  0x86   :  { %388 = vmatprep.subr.bf16.mxu0 %v1854_v24  ;;  %v2446_v18 = vsub.s32 1, %v203_v17  ;;  %v2448_v19 = vsub.s32 0, %v203_v17 }
  0x87   :  { %638 = vmatpush1.bf16.msra.mxu1 %v1898_v41  ;;  %v1940_v41 = vld [vmem:[#allocation10 + $0x40] sm:$0xff]  }
  0x88   :  { %639 = vmatprep.subr.bf16.mxu1 %v1899_v43  ;;  %v209_v22 = vrot.slane %v200_v20, %v2446_v18  ;;  %v205_v23 = vrot.slane %v200_v20, %v2448_v19  ;;  %v453_v43 = vld [vmem:[%s2516_s5] sm:$0x3] }
  0x89   :  { %389 = vmatpush2.bf16.msra.mxu0 %v1856_v26 }
  0x8a   :  { %390 = vmatprep.subr.bf16.mxu0 %v1857_v28 }
  0x8b   :  { %640 = vmatpush1.bf16.msra.mxu1 %v1901_v45  ;;  %v462_v45 = vrot.slane %v453_v43, %v2446_v18 }
  0x8c   :  { %641 = vmatprep.subr.bf16.mxu1 %v1902_v47 }
  0x8d   :  { %391 = vmatpush2.bf16.msra.mxu0 %v1859_v30 }
  0x8e   :  { %392 = vmatprep.subr.bf16.mxu0 %v1860_v32 }
  0x8f   :  { %642 = vmatpush2.bf16.msra.mxu1 %v1904_v49 }
  0x90   :  { %643 = vmatprep.subr.bf16.mxu1 %v1905_v51 }
  0x91   :  { %393 = vmatpush2.bf16.msra.mxu0 %v1862_v33 }
  0x92   :  { %394 = vmatprep.subr.bf16.mxu0 %v1863_v35 }
  0x93   :  { %644 = vmatpush2.bf16.msra.mxu1 %v1907_v53 }
  0x94   :  { %645 = vmatprep.subr.bf16.mxu1 %v1908_v57 }
  0x95   :  { %395 = vmatpush2.bf16.msra.mxu0 %v1865_v38  ;;  %v1937_v38 = vld [vmem:[#allocation10 + $0x10] sm:$0xff]  }
  0x96   :  { %396 = vmatprep.subr.bf16.mxu0 %v1866_v40  ;;  %v1939_v40 = vld [vmem:[#allocation10 + $0x8] sm:$0xff]  }
  0x97   :  { %646 = vmatpush2.bf16.msra.mxu1 %v1910_v58 }
  0x98   :  { %647 = vmatprep.subr.bf16.mxu1 %v1911_v59 }
  0x99   :  { %397 = vmatpush2.bf16.msra.mxu0 %v1868_v42  ;;  %v1941_v42 = vld [vmem:[#allocation10] sm:$0xff]  }
  0x9a   :  { %398 = vmatprep.subr.bf16.mxu0 %v1869_v44 }
  0x9b   :  { %648 = vmatpush2.bf16.msra.mxu1 %v1913_v61  ;;  %v1688_v61 = vld [vmem:[%s2518_s7] ss:$0 sm:$0xff] }
  0x9c   :  { %649 = vmatprep.subr.bf16.mxu1 %v1914_v62 }
  0x9d   :  { %399 = vmatpush2.bf16.msra.mxu0 %v1871_v46  ;;  %v458_v46 = vrot.slane %v453_v43, %v2448_v19  ;;  %v1963_v43 = vld [vmem:[#allocation11] ss:$8 sps:$4 sm:$0xff]  }
  0x9e   :  { %400 = vmatprep.subr.bf16.mxu0 %v1872_v48 }
  0x9f   :  { %650 = vmatpush2.bf16.msra.mxu1 %v1916_v63 }
  0xa0   :  { %651 = vmatprep.subr.bf16.mxu1 %v1917_v0 }
  0xa1   :  { %401 = vmatpush2.bf16.msra.mxu0 %v1874_v50 }
  0xa2   :  { %402 = vmatprep.subr.bf16.mxu0 %v1875_v52 }
  0xa3   :  { %652 = vmatpush2.bf16.msra.mxu1 %v1919_v1  ;;  %v852_v1 = vld [vmem:[#allocation5] sm:$0xff] }
  0xa4   :  { %653 = vmatprep.subr.bf16.mxu1 %v1920_v2 }
  0xa5   :  { %403 = vmatpush2.bf16.msra.mxu0 %v1877_v54 }
  0xa6   :  { %1789 = vmatprep.subr.bf16.mxu0 %v1926_v6  ;;  %v853_v6 = vld [vmem:[#allocation5 + $0x8] sm:$0xff] }
  0xa7   :  { %654 = vmatpush2.bf16.msra.mxu1 %v1922_v3 }
  0xa8   :  { %405 = vmatmul.mubr.bf16.vlgmr.msra.gmra.mxu0 %v166_v60  ;;  %655 = vmatprep.subr.bf16.mxu1 %v1923_v4 }
  0xa9   :  { %1790 = vmatpush3.bf16.msra.mxu0 %v1927_v7 }
  0xaa   :  { %1791 = vmatprep.subr.bf16.mxu0 %v1928_v8 }
  0xab   :  { %656 = vmatpush2.bf16.msra.mxu1 %v1925_v5 }
  0xad   :  { %1792 = vmatpush3.bf16.msra.mxu0 %v1929_v9  ;;  %v2464_v9 = vand.u32 127, %v202_v16  ;;  %v1945_v16 = vld [vmem:[#allocation11 + $0x60] ss:$8 sps:$4 sm:$0xff]  }
  0xae   :  { %1793 = vmatprep.subr.bf16.mxu0 %v1930_v10 }
  0xb1   :  { %1794 = vmatpush3.bf16.msra.mxu0 %v1931_v11 }
  0xb2   :  { %1795 = vmatprep.subr.bf16.mxu0 %v1932_v12 }
  0xb5   :  { %1796 = vmatpush3.bf16.msra.mxu0 %v1933_v13 }
  0xb6   :  { %1797 = vmatprep.subr.bf16.mxu0 %v1934_v14 }
  0xb9   :  { %1798 = vmatpush3.bf16.msra.mxu0 %v1935_v15 }
  0xba   :  { %1799 = vmatprep.subr.bf16.mxu0 %v1936_v37 }
  0xbd   :  { %1800 = vmatpush3.bf16.msra.mxu0 %v1937_v38 }
  0xbe   :  { %1801 = vmatprep.subr.bf16.mxu0 %v1938_v39 }
  0xc1   :  { %1802 = vmatpush3.bf16.msra.mxu0 %v1939_v40  ;;  %v1962_v40 = vld [vmem:[#allocation11 + $0x14] ss:$8 sps:$4 sm:$0xff]  }
  0xc2   :  { %1803 = vmatprep.subr.bf16.mxu0 %v1940_v41  ;;  %v1960_v41 = vld [vmem:[#allocation11 + $0x10] ss:$8 sps:$4 sm:$0xff]  }
  0xc5   :  { %1804 = vmatpush3.bf16.msra.mxu0 %v1941_v42  ;;  %v1965_v42 = vld [vmem:[#allocation11 + $0x4] ss:$8 sps:$4 sm:$0xff]  }
 0x168   :  { %v406_v21 = vpop.f32.mrf.mxu0 }
 0x169   :  { %v407_v28 = vadd.f32 %v406_v21, %v205_v23  ;;  %v1942_v21 = vld [vmem:[#allocation11 + $0x70] ss:$8 sps:$4 sm:$0xff]  }
 0x16a   :  { %v408_v24 = vpop.f32.mrf.mxu0 }
 0x16b   :  { %v409_v26 = vadd.f32 %v408_v24, %v209_v22  ;;  %v415_v34 = vmax.f32 %v407_v28, 0.0  ;;  %v1950_v24 = vld [vmem:[#allocation11 + $0x54] ss:$8 sps:$4 sm:$0xff]  }
 0x16c   :  { %v410_v25 = vpop.f32.mrf.mxu0  ;;  %v1956_v28 = vld [vmem:[#allocation11 + $0x34] ss:$8 sps:$4 sm:$0xff]  }
 0x16d   :  { %v411_v27 = vadd.f32 %v410_v25, %v205_v23  ;;  %v416_v32 = vmax.f32 %v409_v26, 0.0  ;;  %v1947_v23 = vld [vmem:[#allocation11 + $0x64] ss:$8 sps:$4 sm:$0xff]   ;;  %v1948_v25 = vld [vmem:[#allocation11 + $0x50] ss:$8 sps:$4 sm:$0xff]  }
 0x16e   :  { %v412_v29 = vpop.f32.mrf.mxu0  ;;  %v1953_v26 = vld [vmem:[#allocation11 + $0x44] ss:$8 sps:$4 sm:$0xff]  }
 0x16f   :  { %v413_v30 = vadd.f32 %v412_v29, %v209_v22  ;;  %v417_v31 = vmax.f32 %v411_v27, 0.0  ;;  %v1944_v22 = vld [vmem:[#allocation11 + $0x74] ss:$8 sps:$4 sm:$0xff]   ;;  %v1951_v27 = vld [vmem:[#allocation11 + $0x40] ss:$8 sps:$4 sm:$0xff]  }
 0x170   :  { %1011 = vmatprep.subr.bf16.mxu1 %v1944_v22  ;;  %v1954_v29 = vld [vmem:[#allocation11 + $0x30] ss:$8 sps:$4 sm:$0xff]   ;;  %v2007_v22 = vld [vmem:[#allocation13 + $0xa4] ss:$8 sps:$4 sm:$0xff]  }
 0x171   :  { %v418_v33 = vmax.f32 %v413_v30, 0.0  ;;  %v419_v36 = vpack.c.bf16 %v417_v31, %v415_v34  ;;  %v1959_v30 = vld [vmem:[#allocation11 + $0x24] ss:$8 sps:$4 sm:$0xff]   ;;  %v1957_v31 = vld [vmem:[#allocation11 + $0x20] ss:$8 sps:$4 sm:$0xff]  }
 0x173   :  { %v420_v35 = vpack.c.bf16 %v418_v33, %v416_v32 }
 0x175   :  { %657 = vmatprep.mubr.bf16.mxu1 %v420_v35 }
 0x176   :  { %658 = vmatmul.mubr.bf16.vlgmr.msra.gmra.mxu1 %v419_v36 }
 0x177   :  { %1012 = vmatpush1.bf16.msra.mxu1 %v1942_v21  ;;  %v2311_v21 = vmov 1.0|1.0  }
 0x178   :  { %1013 = vmatprep.subr.bf16.mxu1 %v1947_v23  ;;  %v2005_v23 = vld [vmem:[#allocation13 + $0xa0] ss:$8 sps:$4 sm:$0xff]  }
 0x17b   :  { %1014 = vmatpush1.bf16.msra.mxu1 %v1945_v16  ;;  %v2010_v16 = vld [vmem:[#allocation13 + $0x94] ss:$8 sps:$4 sm:$0xff]  }
 0x17c   :  { %1015 = vmatprep.subr.bf16.mxu1 %v1950_v24  ;;  %v2008_v24 = vld [vmem:[#allocation13 + $0x90] ss:$8 sps:$4 sm:$0xff]  }
 0x17f   :  { %1016 = vmatpush1.bf16.msra.mxu1 %v1948_v25  ;;  %v2013_v25 = vld [vmem:[#allocation13 + $0x84] ss:$8 sps:$4 sm:$0xff]  }
 0x180   :  { %1017 = vmatprep.subr.bf16.mxu1 %v1953_v26  ;;  %v2011_v26 = vld [vmem:[#allocation13 + $0x80] ss:$8 sps:$4 sm:$0xff]  }
 0x183   :  { %1018 = vmatpush1.bf16.msra.mxu1 %v1951_v27  ;;  %v2014_v27 = vld [vmem:[#allocation14 + $0x70] ss:$8 sps:$4 sm:$0xff]  }
 0x184   :  { %1019 = vmatprep.subr.bf16.mxu1 %v1956_v28  ;;  %v2016_v28 = vld [vmem:[#allocation14 + $0x74] ss:$8 sps:$4 sm:$0xff]  }
 0x187   :  { %1020 = vmatpush1.bf16.msra.mxu1 %v1954_v29  ;;  %v2019_v29 = vld [vmem:[#allocation14 + $0x64] ss:$8 sps:$4 sm:$0xff]  }
 0x188   :  { %1021 = vmatprep.subr.bf16.mxu1 %v1959_v30  ;;  %v2022_v30 = vld [vmem:[#allocation14 + $0x54] ss:$8 sps:$4 sm:$0xff]  }
 0x18b   :  { %1022 = vmatpush1.bf16.msra.mxu1 %v1957_v31  ;;  %v2020_v31 = vld [vmem:[#allocation14 + $0x50] ss:$8 sps:$4 sm:$0xff]  }
 0x18c   :  { %1023 = vmatprep.subr.bf16.mxu1 %v1962_v40  ;;  %v2037_v40 = vld [vmem:[#allocation14 + $0x4] ss:$8 sps:$4 sm:$0xff]  }
 0x18f   :  { %1024 = vmatpush1.bf16.msra.mxu1 %v1960_v41  ;;  %v2035_v41 = vld [vmem:[#allocation14] ss:$8 sps:$4 sm:$0xff]  }
 0x190   :  { %1025 = vmatprep.subr.bf16.mxu1 %v1965_v42  ;;  %v2040_v42 = vld [vmem:[#allocation14 + $0xf4] ss:$8 sps:$4 sm:$0xff]  }
 0x193   :  { %1026 = vmatpush1.bf16.msra.mxu1 %v1963_v43  ;;  %v2038_v43 = vld [vmem:[#allocation14 + $0xf0] ss:$8 sps:$4 sm:$0xff]  }
 0x194   :  { %1517 = vmatprep.subr.bf16.mxu1 %v2016_v28 }
 0x236   :  { %v659_v44 = vpop.f32.mrf.mxu1 }
 0x237   :  { %v660_v51 = vadd.f32 %v659_v44, %v458_v46  ;;  %v2310_v44 = vmov 0  }
 0x238   :  { %v661_v47 = vpop.f32.mrf.mxu1  ;;  %1043 = vmatprep.mubr.bf16.mxu1 %v2310_v44  ;;  %v2043_v44 = vld [vmem:[#allocation14 + $0xe4] ss:$8 sps:$4 sm:$0xff]  }
 0x239   :  { %v662_v49 = vadd.f32 %v661_v47, %v462_v45  ;;  %v668_v57 = vmax.f32 %v660_v51, 0.0  ;;  %v1971_v47 = vld [vmem:[#allocation13 + $0x64] ss:$8 sps:$4 sm:$0xff]  }
 0x23a   :  { %v663_v48 = vpop.f32.mrf.mxu1  ;;  %v1977_v51 = vld [vmem:[#allocation13 + $0x44] ss:$8 sps:$4 sm:$0xff]  }
 0x23b   :  { %v664_v50 = vadd.f32 %v663_v48, %v458_v46  ;;  %v669_v55 = vmax.f32 %v662_v49, 0.0  ;;  %v1968_v46 = vld [vmem:[#allocation13 + $0x74] ss:$8 sps:$4 sm:$0xff]   ;;  %v1969_v48 = vld [vmem:[#allocation13 + $0x60] ss:$8 sps:$4 sm:$0xff]  }
 0x23c   :  { %v665_v52 = vpop.f32.mrf.mxu1  ;;  %1264 = vmatprep.subr.bf16.mxu0 %v1968_v46  ;;  %v1974_v49 = vld [vmem:[#allocation13 + $0x54] ss:$8 sps:$4 sm:$0xff]  }
 0x23d   :  { %v666_v53 = vadd.f32 %v665_v52, %v462_v45  ;;  %v670_v54 = vmax.f32 %v664_v50, 0.0  ;;  %v1966_v45 = vld [vmem:[#allocation13 + $0x70] ss:$8 sps:$4 sm:$0xff]   ;;  %v1975_v52 = vld [vmem:[#allocation13 + $0x40] ss:$8 sps:$4 sm:$0xff]  }
 0x23e   :  { %v1972_v50 = vld [vmem:[#allocation13 + $0x50] ss:$8 sps:$4 sm:$0xff]   ;;  %v2046_v46 = vld [vmem:[#allocation14 + $0xd4] ss:$8 sps:$4 sm:$0xff]  }
 0x23f   :  { %v671_v56 = vmax.f32 %v666_v53, 0.0  ;;  %v672_v59 = vpack.c.bf16 %v670_v54, %v668_v57  ;;  %v1980_v53 = vld [vmem:[#allocation13 + $0x34] ss:$8 sps:$4 sm:$0xff]   ;;  %v1978_v54 = vld [vmem:[#allocation13 + $0x30] ss:$8 sps:$4 sm:$0xff]  }
 0x240   :  { %v1986_v57 = vld [vmem:[#allocation13 + $0x14] ss:$8 sps:$4 sm:$0xff]  }
 0x241   :  { %v673_v58 = vpack.c.bf16 %v671_v56, %v669_v55  ;;  %v1983_v55 = vld [vmem:[#allocation13 + $0x24] ss:$8 sps:$4 sm:$0xff]   ;;  %v1981_v56 = vld [vmem:[#allocation13 + $0x20] ss:$8 sps:$4 sm:$0xff]  }
 0x243   :  { %841 = vmatprep.mubr.bf16.mxu0 %v673_v58  ;;  %v1984_v58 = vld [vmem:[#allocation13 + $0x10] ss:$8 sps:$4 sm:$0xff]  }
 0x244   :  { %842 = vmatmul.mubr.bf16.vlgmr.msra.gmra.mxu0 %v672_v59  ;;  %v1989_v59 = vld [vmem:[#allocation13 + $0x4] ss:$8 sps:$4 sm:$0xff]  }
 0x245   :  { %1265 = vmatpush1.bf16.msra.mxu0 %v1966_v45  ;;  %v2041_v45 = vld [vmem:[#allocation14 + $0xe0] ss:$8 sps:$4 sm:$0xff]  }
 0x246   :  { %1266 = vmatprep.subr.bf16.mxu0 %v1971_v47  ;;  %v2044_v47 = vld [vmem:[#allocation14 + $0xd0] ss:$8 sps:$4 sm:$0xff]  }
 0x249   :  { %1267 = vmatpush1.bf16.msra.mxu0 %v1969_v48  ;;  %v2049_v48 = vld [vmem:[#allocation14 + $0xc4] ss:$8 sps:$4 sm:$0xff]  }
 0x24a   :  { %1268 = vmatprep.subr.bf16.mxu0 %v1974_v49  ;;  %v2047_v49 = vld [vmem:[#allocation14 + $0xc0] ss:$8 sps:$4 sm:$0xff]  }
 0x24d   :  { %1269 = vmatpush1.bf16.msra.mxu0 %v1972_v50  ;;  %v2052_v50 = vld [vmem:[#allocation14 + $0xb4] ss:$8 sps:$4 sm:$0xff]  }
 0x24e   :  { %1270 = vmatprep.subr.bf16.mxu0 %v1977_v51  ;;  %v2050_v51 = vld [vmem:[#allocation14 + $0xb0] ss:$8 sps:$4 sm:$0xff]  }
 0x251   :  { %1271 = vmatpush1.bf16.msra.mxu0 %v1975_v52  ;;  %v919_v52 = vld [vmem:[%s2520_s9] sm:$0x3] }
 0x252   :  { %1272 = vmatprep.subr.bf16.mxu0 %v1980_v53 }
 0x255   :  { %1273 = vmatpush1.bf16.msra.mxu0 %v1978_v54  ;;  %v928_v54 = vrot.slane %v919_v52, %v2446_v18 }
 0x256   :  { %1274 = vmatprep.subr.bf16.mxu0 %v1983_v55  ;;  %v924_v55 = vrot.slane %v919_v52, %v2448_v19 }
 0x259   :  { %1275 = vmatpush1.bf16.msra.mxu0 %v1981_v56 }
 0x25a   :  { %1276 = vmatprep.subr.bf16.mxu0 %v1986_v57 }
 0x25d   :  { %1277 = vmatpush1.bf16.msra.mxu0 %v1984_v58 }
 0x25e   :  { %1278 = vmatprep.subr.bf16.mxu0 %v1989_v59 }
 0x304   :  { %v1805_v60 = vpop.f32.mrf.mxu0 }
 0x306   :  { %v1806_v62 = vpop.f32.mrf.mxu0 }
 0x307   :  { %v1807_v63 = vadd.f32 %v1806_v62, %v1805_v60  ;;  %v1987_v60 = vld [vmem:[#allocation13] ss:$8 sps:$4 sm:$0xff]   ;;  %v1990_v62 = vld [vmem:[#allocation13 + $0xf0] ss:$8 sps:$4 sm:$0xff]  }
 0x308   :  { %v1808_v0 = vpop.f32.mrf.mxu0  ;;  %1279 = vmatpush1.bf16.msra.mxu0 %v1987_v60 }
 0x309   :  { %v844_v2 = vadd.f32 %v1807_v63, %v1688_v61  ;;  %v1995_v63 = vld [vmem:[#allocation13 + $0xe4] ss:$8 sps:$4 sm:$0xff]  }
 0x30a   :  { %v1809_v3 = vpop.f32.mrf.mxu0 }
 0x30b   :  { %850 = vst [vmem:[#allocation16] sm:$0xff] %v844_v2  ;;  %v1810_v4 = vadd.f32 %v1809_v3, %v1808_v0  ;;  %v854_v5 = vadd.f32 %v852_v1, %v844_v2  ;;  %v1993_v0 = vld [vmem:[#allocation13 + $0xe0] ss:$8 sps:$4 sm:$0xff]   ;;  %v1998_v1 = vld [vmem:[#allocation13 + $0xd4] ss:$8 sps:$4 sm:$0xff]  }
 0x30c   :  { %v1996_v2 = vld [vmem:[#allocation13 + $0xd0] ss:$8 sps:$4 sm:$0xff]   ;;  %v2001_v3 = vld [vmem:[#allocation13 + $0xc4] ss:$8 sps:$4 sm:$0xff]  }
 0x30d   :  { %v847_v7 = vadd.f32 %v1810_v4, %v1688_v61  ;;  %858 = vmax.xlane.f32.xlu0 %v854_v5  ;;  %v1992_v61 = vld [vmem:[#allocation13 + $0xf4] ss:$8 sps:$4 sm:$0xff]   ;;  %v1999_v4 = vld [vmem:[#allocation13 + $0xc0] ss:$8 sps:$4 sm:$0xff]  }
 0x30e   :  { %1280 = vmatprep.subr.bf16.mxu0 %v1992_v61 }
 0x30f   :  { %851 = vst [vmem:[#allocation16 + $0x8] sm:$0xff] %v847_v7  ;;  %v855_v8 = vadd.f32 %v853_v6, %v847_v7  ;;  %1281 = vmatpush2.bf16.msra.mxu0 %v1990_v62  ;;  %v2002_v6 = vld [vmem:[#allocation13 + $0xb0] ss:$8 sps:$4 sm:$0xff]  }
 0x310   :  { %1282 = vmatprep.subr.bf16.mxu0 %v1995_v63 }
 0x311   :  { %860 = vmax.xlane.f32.xlu0 %v855_v8 }
 0x313   :  { %1283 = vmatpush2.bf16.msra.mxu0 %v1993_v0 }
 0x314   :  { %1284 = vmatprep.subr.bf16.mxu0 %v1998_v1 }
 0x317   :  { %1285 = vmatpush2.bf16.msra.mxu0 %v1996_v2 }
 0x318   :  { %1286 = vmatprep.subr.bf16.mxu0 %v2001_v3 }
 0x31b   :  { %1287 = vmatpush2.bf16.msra.mxu0 %v1999_v4 }
 0x396   :  { %v859_v10 = vpop.xlane.xlu0 %858 }
 0x397   :  { %vm862_vm0 = vcmp.ge.f32.partialorder %v854_v5, %v859_v10  ;;  %v2004_v5 = vld [vmem:[#allocation13 + $0xb4] ss:$8 sps:$4 sm:$0xff]  }
 0x398   :  { %v864_v11 = vsel %vm862_vm0, %v2464_v9, 128  ;;  %1288 = vmatprep.subr.bf16.mxu0 %v2004_v5  ;;  %v2055_v5 = vld [vmem:[#allocation14 + $0xa4] ss:$8 sps:$4 sm:$0xff]  }
 0x399   :  { %v867_v12 = vshra.s32 %v864_v11, 16  ;;  %v866_v32 = vand.u32 65535, %v864_v11  ;;  %1289 = vmatpush2.bf16.msra.mxu0 %v2002_v6  ;;  %v2053_v6 = vld [vmem:[#allocation14 + $0xa0] ss:$8 sps:$4 sm:$0xff]  }
 0x39a   :  { %v861_v13 = vpop.xlane.xlu0 %860  ;;  %1290 = vmatprep.subr.bf16.mxu0 %v2007_v22 }
 0x39b   :  { %vm863_vm1 = vcmp.ge.f32.partialorder %v855_v8, %v861_v13  ;;  %v869_v14 = vcvt.s32.f32 %v867_v12  ;;  %v868_v35 = vcvt.s32.f32 %v866_v32  ;;  %v2025_v32 = vld [vmem:[#allocation14 + $0x44] ss:$8 sps:$4 sm:$0xff]  }
 0x39c   :  { %v865_v15 = vsel %vm863_vm1, %v2464_v9, 128 }
 0x39d   :  { %870 = vmin.xlane.f32.xlu1 %v869_v14  ;;  %v881_v17 = vshra.s32 %v865_v15, 16  ;;  %v880_v33 = vand.u32 65535, %v865_v15  ;;  %1291 = vmatpush2.bf16.msra.mxu0 %v2005_v23 }
 0x39e   :  { %1292 = vmatprep.subr.bf16.mxu0 %v2010_v16 }
 0x39f   :  { %v883_v20 = vcvt.s32.f32 %v881_v17  ;;  %v882_v38 = vcvt.s32.f32 %v880_v33  ;;  %v2023_v33 = vld [vmem:[#allocation14 + $0x40] ss:$8 sps:$4 sm:$0xff]  }
 0x3a1   :  { %884 = vmin.xlane.f32.xlu1 %v883_v20  ;;  %1293 = vmatpush2.bf16.msra.mxu0 %v2008_v24 }
 0x3a2   :  { %1294 = vmatprep.subr.bf16.mxu0 %v2013_v25 }
 0x3a5   :  { %1295 = vmatpush2.bf16.msra.mxu0 %v2011_v26 }
 0x426   :  { %v2468_v34 = vpop.xlane.xlu1 %870 }
 0x427   :  { %vm872_vm2 = vcmp.eq.f32.partialorder %v869_v14, %v2468_v34  ;;  %v877_v7 = vcvt.f32.s32 %v2468_v34  ;;  %v2028_v34 = vld [vmem:[#allocation14 + $0x34] ss:$8 sps:$4 sm:$0xff]  }
 0x428   :  { %v873_v36 = vsel %vm872_vm2, %v868_v35, inf  ;;  %v2026_v35 = vld [vmem:[#allocation14 + $0x30] ss:$8 sps:$4 sm:$0xff]  }
 0x429   :  { %874 = vmin.xlane.f32.xlu0 %v873_v36  ;;  %v878_v10 = vshll.u32 %v877_v7, 16  ;;  %v2031_v36 = vld [vmem:[#allocation14 + $0x24] ss:$8 sps:$4 sm:$0xff]   ;;  %v2058_v7 = vld [vmem:[#allocation14 + $0x94] ss:$8 sps:$4 sm:$0xff]  }
 0x42a   :  { %v2471_v37 = vpop.xlane.xlu1 %884 }
 0x42b   :  { %vm886_vm3 = vcmp.eq.f32.partialorder %v883_v20, %v2471_v37  ;;  %v891_v11 = vcvt.f32.s32 %v2471_v37  ;;  %v2029_v37 = vld [vmem:[#allocation14 + $0x20] ss:$8 sps:$4 sm:$0xff]  }
 0x42c   :  { %v887_v39 = vsel %vm886_vm3, %v882_v38, inf  ;;  %v2034_v38 = vld [vmem:[#allocation14 + $0x14] ss:$8 sps:$4 sm:$0xff]  }
 0x42d   :  { %888 = vmin.xlane.f32.xlu1 %v887_v39  ;;  %v892_v15 = vshll.u32 %v891_v11, 16  ;;  %v2032_v39 = vld [vmem:[#allocation14 + $0x10] ss:$8 sps:$4 sm:$0xff]   ;;  %v2059_v11 = vld [vmem:[#allocation14 + $0x80] ss:$8 sps:$4 sm:$0xff]  }
 0x4b2   :  { %v875_v8 = vpop.xlane.xlu0 %874 }
 0x4b3   :  { %v876_v12 = vcvt.f32.s32 %v875_v8  ;;  %v2056_v8 = vld [vmem:[#allocation14 + $0x90] ss:$8 sps:$4 sm:$0xff]  }
 0x4b5   :  { %v879_v13 = vadd.s32 %v878_v10, %v876_v12  ;;  %v2061_v10 = vld [vmem:[#allocation14 + $0x84] ss:$8 sps:$4 sm:$0xff]   ;;  %v1092_v12 = vld [vmem:[%s2522_s11] sm:$0x3]  ;;  %s2312_s11 = smov [#allocation17]  }
 0x4b6   :  { %v889_v14 = vpop.xlane.xlu1 %888  ;;  %s1589_s26 = sshll.u32 %s2312_s11, 4  ;;  %s1590_s26 = int_to_ptr.vmem [resolvable:$true] %s1589_s26 }
 0x4b7   :  { %894 = vst [vmem:[#allocation17] sm:$0xff] %v879_v13  ;;  %v890_v17 = vcvt.f32.s32 %v889_v14  ;;  %vm896_vm4 = vcmp.eq.s32.totalorder %v2464_v9, %v879_v13  ;;  %v1101_v14 = vrot.slane %v1092_v12, %v2446_v18  ;;  %s2222_s30 = scalar_lea.vmem %s1590_s26, 256  ;;  %p2227_p13 = scmp.lt.s32.totalorder %s1590_s26, %s1590_s26 }
 0x4b8   :  { %p2223_p12 = scmp.ne.s32.totalorder %s1590_s26, %s2222_s30  ;;  %p2228_p0 = scmp.lt.s32.totalorder %s2222_s30, %s2222_s30 }
 0x4b9   :  { %v893_v20 = vadd.s32 %v892_v15, %v890_v17  ;;  %v1097_v15 = vrot.slane %v1092_v12, %v2448_v19 }
 0x4ba   :  { %p2229_p1 = por %p2228_p0, %p2227_p13 }
 0x4bb   :  { %vm897_vm5 = vcmp.eq.s32.totalorder %v2464_v9, %v893_v20  ;;  %895 = vst [vmem:[#allocation17 + $0x8] sm:$0xff] %v893_v20  ;;  %v2017_v9 = vld [vmem:[#allocation14 + $0x60] ss:$8 sps:$4 sm:$0xff]  }
 0x4bc   :  { %vm1723_vm6 = vmpackc.low %vm897_vm5, %vm896_vm4  ;;  %p2230_p2 = pnand %p2229_p1, %p2223_p12 }
 0x4bd   :  { %1724 = vmatmul.mubr.msk.bf16.vlgmr.msra.gmra.mxu1 %vm1723_vm6, %v2311_v21 }
 0x4be   :  { %1518 = vmatpush1.bf16.msra.mxu1 %v2014_v27 }
 0x4bf   :  { %1519 = vmatprep.subr.bf16.mxu1 %v2019_v29 }
 0x4c2   :  { %1520 = vmatpush1.bf16.msra.mxu1 %v2017_v9 }
 0x4c3   :  { %1521 = vmatprep.subr.bf16.mxu1 %v2022_v30 }
 0x4c6   :  { %1522 = vmatpush1.bf16.msra.mxu1 %v2020_v31 }
 0x4c7   :  { %1523 = vmatprep.subr.bf16.mxu1 %v2025_v32 }
 0x4ca   :  { %1524 = vmatpush1.bf16.msra.mxu1 %v2023_v33 }
 0x4cb   :  { %1525 = vmatprep.subr.bf16.mxu1 %v2028_v34 }
 0x4ce   :  { %1526 = vmatpush1.bf16.msra.mxu1 %v2026_v35 }
 0x4cf   :  { %1527 = vmatprep.subr.bf16.mxu1 %v2031_v36 }
 0x4d2   :  { %1528 = vmatpush1.bf16.msra.mxu1 %v2029_v37 }
 0x4d3   :  { %1529 = vmatprep.subr.bf16.mxu1 %v2034_v38 }
 0x4d6   :  { %1530 = vmatpush1.bf16.msra.mxu1 %v2032_v39 }
 0x4d7   :  { %1531 = vmatprep.subr.bf16.mxu1 %v2037_v40 }
 0x4da   :  { %1532 = vmatpush1.bf16.msra.mxu1 %v2035_v41 }
 0x4db   :  { %1533 = vmatprep.subr.bf16.mxu1 %v2040_v42 }
 0x4de   :  { %1534 = vmatpush2.bf16.msra.mxu1 %v2038_v43 }
 0x4df   :  { %1535 = vmatprep.subr.bf16.mxu1 %v2043_v44 }
 0x4e2   :  { %1536 = vmatpush2.bf16.msra.mxu1 %v2041_v45 }
 0x4e3   :  { %1537 = vmatprep.subr.bf16.mxu1 %v2046_v46 }
 0x4e6   :  { %1538 = vmatpush2.bf16.msra.mxu1 %v2044_v47 }
 0x4e7   :  { %1539 = vmatprep.subr.bf16.mxu1 %v2049_v48 }
 0x4ea   :  { %1540 = vmatpush2.bf16.msra.mxu1 %v2047_v49 }
 0x4eb   :  { %1541 = vmatprep.subr.bf16.mxu1 %v2052_v50 }
 0x4ee   :  { %1542 = vmatpush2.bf16.msra.mxu1 %v2050_v51 }
 0x4ef   :  { %1543 = vmatprep.subr.bf16.mxu1 %v2055_v5 }
 0x4f2   :  { %1544 = vmatpush2.bf16.msra.mxu1 %v2053_v6 }
 0x4f3   :  { %1545 = vmatprep.subr.bf16.mxu1 %v2058_v7 }
 0x4f6   :  { %1546 = vmatpush2.bf16.msra.mxu1 %v2056_v8 }
 0x4f7   :  { %1547 = vmatprep.subr.bf16.mxu1 %v2061_v10 }
 0x4fa   :  { %1548 = vmatpush2.bf16.msra.mxu1 %v2059_v11 }
 0x57d   :  { %v1045_v53 = vpop.f32.mrf.mxu1 }
 0x57e   :  { %v1046_v60 = vadd.f32 %v1045_v53, %v924_v55 }
 0x57f   :  { %v1047_v56 = vpop.f32.mrf.mxu1 }
 0x580   :  { %v1048_v58 = vadd.f32 %v1047_v56, %v928_v54  ;;  %v1054_v2 = vmax.f32 %v1046_v60, 0.0 }
 0x581   :  { %v1049_v57 = vpop.f32.mrf.mxu1 }
 0x582   :  { %v1050_v59 = vadd.f32 %v1049_v57, %v924_v55  ;;  %v1055_v0 = vmax.f32 %v1048_v58, 0.0 }
 0x583   :  { %v1051_v61 = vpop.f32.mrf.mxu1 }
 0x584   :  { %v1052_v62 = vadd.f32 %v1051_v61, %v928_v54  ;;  %v1056_v63 = vmax.f32 %v1050_v59, 0.0 }
 0x586   :  { %v1057_v1 = vmax.f32 %v1052_v62, 0.0  ;;  %v1058_v4 = vpack.c.bf16 %v1056_v63, %v1054_v2 }
 0x588   :  { %v1059_v3 = vpack.c.bf16 %v1057_v1, %v1055_v0 }
 0x58a   :  { %1296 = vmatprep.mubr.bf16.mxu0 %v1059_v3 }
 0x58b   :  { %1297 = vmatmul.mubr.bf16.vlgmr.msra.gmra.mxu0 %v1058_v4 }
 0x64b   :  { %v1298_v13 = vpop.f32.mrf.mxu0 }
 0x64c   :  { %v1299_v23 = vadd.f32 %v1298_v13, %v1097_v15 }
 0x64d   :  { %v1300_v17 = vpop.f32.mrf.mxu0 }
 0x64e   :  { %v1301_v21 = vadd.f32 %v1300_v17, %v1101_v14  ;;  %v1307_v28 = vmax.f32 %v1299_v23, 0.0 }
 0x64f   :  { %v1302_v20 = vpop.f32.mrf.mxu0 }
 0x650   :  { %v1303_v22 = vadd.f32 %v1302_v20, %v1097_v15  ;;  %v1308_v26 = vmax.f32 %v1301_v21, 0.0 }
 0x651   :  { %v1304_v16 = vpop.f32.mrf.mxu0 }
 0x652   :  { %v1305_v24 = vadd.f32 %v1304_v16, %v1101_v14  ;;  %v1309_v25 = vmax.f32 %v1303_v22, 0.0 }
 0x654   :  { %v1310_v27 = vmax.f32 %v1305_v24, 0.0  ;;  %v1311_v9 = vpack.c.bf16 %v1309_v25, %v1307_v28 }
 0x656   :  { %v1312_v29 = vpack.c.bf16 %v1310_v27, %v1308_v26 }
 0x658   :  { %1549 = vmatprep.mubr.bf16.mxu1 %v1312_v29 }
 0x659   :  { %1550 = vmatmul.mubr.bf16.vlgmr.msra.gmra.mxu1 %v1311_v9 }
 0x65a   :  { %2233 = shalt.err (!%p2230_p2)
}
 0x65b   :  { %1595 = dma.vmem_to_hbm [thread:$0]  %s1590_s26, 256, %s2526_s15, [#allocation18], %s2297_s24, %s2297_s24, %s2298_s25  }
 0x65c   :  { %s2242_s2 = scalar_lea.vmem %s1578_s29, 256  ;;  %p2247_p4 = scmp.lt.s32.totalorder %s1578_s29, %s1578_s29 }
 0x65d   :  { %p2243_p3 = scmp.ne.s32.totalorder %s1578_s29, %s2242_s2  ;;  %p2248_p5 = scmp.lt.s32.totalorder %s2242_s2, %s2242_s2 }
 0x65f   :  { %p2249_p6 = por %p2248_p5, %p2247_p4 }
 0x661   :  { %p2250_p7 = pnand %p2249_p6, %p2243_p3 }
 0x663   :  { %2253 = shalt.err (!%p2250_p7)
}
 0x664   :  { %1583 = dma.vmem_to_hbm [thread:$0]  %s1578_s29, 256, %s2525_s14, [#allocation4], %s2297_s24, %s2297_s24, %s2298_s25   ;;  %v1560_v34 = vld [vmem:[#allocation2] sm:$0xff]  ;;  %v1561_v37 = vld [vmem:[#allocation2 + $0x8] sm:$0xff]  ;;  %v1562_v41 = vld [vmem:[#allocation2 + $0x10] sm:$0xff] }
 0x665   :  { %v1345_v30 = vld [vmem:[%s2524_s13] sm:$0x3]  ;;  %v1563_v45 = vld [vmem:[#allocation2 + $0x18] sm:$0xff]  ;;  %s2314_s14 = smov [#allocation19]  }
 0x666   :  { %v1350_v31 = vrot.slane %v1345_v30, %v2448_v19  ;;  %v1354_v32 = vrot.slane %v1345_v30, %v2446_v18  ;;  %s1601_s13 = sshll.u32 %s2314_s14, 4  ;;  %s1602_s13 = int_to_ptr.vmem [resolvable:$true] %s1601_s13 }
 0x667   :  { %s2262_s15 = scalar_lea.vmem %s1602_s13, 512  ;;  %p2267_p9 = scmp.lt.s32.totalorder %s1602_s13, %s1602_s13 }
 0x668   :  { %p2263_p8 = scmp.ne.s32.totalorder %s1602_s13, %s2262_s15  ;;  %p2268_p10 = scmp.lt.s32.totalorder %s2262_s15, %s2262_s15 }
 0x66a   :  { %p2269_p11 = por %p2268_p10, %p2267_p9 }
 0x66c   :  { %p2270_p12 = pnand %p2269_p11, %p2263_p8 }
 0x719   :  { %v1551_v33 = vpop.f32.mrf.mxu1 }
 0x71a   :  { %v1552_v35 = vadd.f32 %v1551_v33, %v1350_v31 }
 0x71b   :  { %v1553_v36 = vpop.f32.mrf.mxu1 }
 0x71c   :  { %v1564_v38 = vadd.f32 %v1560_v34, %v1552_v35  ;;  %v1554_v39 = vadd.f32 %v1553_v36, %v1354_v32 }
 0x71d   :  { %v1555_v40 = vpop.f32.mrf.mxu1 }
 0x71e   :  { %1568 = vst [vmem:[#allocation19] sm:$0xff] %v1564_v38  ;;  %v1565_v42 = vadd.f32 %v1561_v37, %v1554_v39  ;;  %v1556_v43 = vadd.f32 %v1555_v40, %v1350_v31 }
 0x71f   :  { %v1557_v44 = vpop.f32.mrf.mxu1 }
 0x720   :  { %1569 = vst [vmem:[#allocation19 + $0x8] sm:$0xff] %v1565_v42  ;;  %v1566_v19 = vadd.f32 %v1562_v41, %v1556_v43  ;;  %v1558_v46 = vadd.f32 %v1557_v44, %v1354_v32 }
 0x722   :  { %1570 = vst [vmem:[#allocation19 + $0x10] sm:$0xff] %v1566_v19  ;;  %v1567_v18 = vadd.f32 %v1563_v45, %v1558_v46 }
 0x724   :  { %1571 = vst [vmem:[#allocation19 + $0x18] sm:$0xff] %v1567_v18 }
 0x725   :  { %2273 = shalt.err (!%p2270_p12)
}
 0x726   :  { %1607 = dma.vmem_to_hbm [thread:$0]  %s1602_s13, 512, %s2527_s16, [#allocation18], %s2302_s4, %s2302_s4, %s2303_s27  }
 0x727   :  { %2292 = dma.done.wait [#allocation4], 256  }
 0x728   :  { %2293 = vsyncadd [#allocation4], 4294967040 }
 0x729   :  { %2294 = dma.done.wait [#allocation18], 768  }
 0x72a   :  { %2295 = vsyncadd [#allocation18], 4294966528 }
 0x72b   :  { %1617 = vsyncpa [#allocation3], 1 }
 0x72c   :  { %1618 = vsyncpa [#allocation6], 1 }
 0x72d   :  { %1619 = vsyncpa [#allocation9], 1 }
 0x72e   :  { %1620 = vsyncpa [#allocation12], 1 }
 0x72f   :  { %1621 = vsyncpa [#allocation15], 1 }
 0x730   :  { %1622 = vsyncpa [#allocation4], 1 }
 0x731   :  { %1623 = vsyncpa [#allocation18], 1 }

</bundles_post_ra>
